<compile_context>
chip_gen: v7x
topology: tpu7x:2x2x1
jax: 0.10.0
libtpu: 0.0.40
codegen_flags: <defaults>
</compile_context>

<pallas_src>
import functools

import jax
import jax.numpy as jnp
from jax import lax
from jax.experimental import pallas as pl
from jax.experimental.pallas import tpu as pltpu


def _round_up(x, m):
    return ((x + m - 1) // m) * m


def _lm_kernel(ids_ref,                       # SMEM  (Tp,) int32   (scalar prefetch)
               emb_hbm,                       # ANY   (Vocab, E) f32 (HBM resident)
               w1_ref,                        # VMEM  (E, H)  bf16
               b1_ref,                        # VMEM  (1, H)  f32
               w2_ref,                        # VMEM  (H, tv) bf16  (V tile)
               b2_ref,                        # VMEM  (1, tv) f32   (V tile)
               mask_ref,                      # VMEM  (tm, 1) f32   (token tile)
               out_ref,                       # VMEM  (tm, tv) f32
               emb_buf,                       # VMEM scratch (tm, E) f32
               hid_buf,                       # VMEM scratch (tm, H) bf16
               dma_sem,                       # DMA semaphore (1,)
               *, tm):
    i = pl.program_id(0)          # token-tile index
    j = pl.program_id(1)          # vocab-tile index (fast axis)

    # Gather + first matmul only once per token tile; reuse for all V tiles.
    @pl.when(j == 0)
    def _():
        base = i * tm

        # Issue all row DMAs (embedding gather from HBM into VMEM scratch).
        def issue(r, carry):
            tok = ids_ref[base + r]
            pltpu.make_async_copy(emb_hbm.at[pl.ds(tok, 1), :],
                                  emb_buf.at[pl.ds(r, 1), :],
                                  dma_sem.at[0]).start()
            return carry
        lax.fori_loop(0, tm, issue, 0, unroll=True)

        # Wait for each equal-sized row copy.
        def wait(r, carry):
            pltpu.make_async_copy(emb_hbm.at[pl.ds(0, 1), :],
                                  emb_buf.at[pl.ds(r, 1), :],
                                  dma_sem.at[0]).wait()
            return carry
        lax.fori_loop(0, tm, wait, 0, unroll=True)

        emb = emb_buf[...].astype(jnp.bfloat16)                 # bf16 MXU input
        hidden = jnp.dot(emb, w1_ref[...],
                         preferred_element_type=jnp.float32)    # f32 accumulate
        hidden = hidden + b1_ref[...]                           # f32 bias add
        hid_buf[...] = hidden.astype(jnp.bfloat16)              # cache for V tiles

    logits = jnp.dot(hid_buf[...], w2_ref[...],
                     preferred_element_type=jnp.float32)        # f32 accumulate
    logits = logits + b2_ref[...]                               # f32 bias add
    # Mask AFTER the bias add (matches the reference semantics).
    out_ref[...] = (logits * mask_ref[...]).astype(out_ref.dtype)


@functools.partial(jax.jit, static_argnames=("tm", "tv"))
def language_model_forward(input_ids, attention_mask, params, *, tm=None, tv=None):
    """input_ids: int [B, S]; attention_mask: float [B, S]."""
    emb_table = params["embedding"]                    # (Vocab, E) f32, stays in HBM
    w1, b1 = params["w1"], params["b1"]                # (E, H), (H,)
    w2, b2 = params["w2"], params["b2"]                # (H, V), (V,)

    B, S = input_ids.shape
    _, E = emb_table.shape
    H = w1.shape[1]
    V = w2.shape[1]
    T = B * S

    # Token tile: multiple of 8 sublanes, >=2 grid steps when possible.
    # TODO(synk): on v6e/v7x with large T, tm=256 + a chunked gather would fill
    # the MXU better; kept at <=128 so per-tile outstanding row DMAs stay small.
    if tm is None:
        tm = 128 if T >= 256 else max(8, _round_up(T, 8) // 2)
        tm = _round_up(tm, 8)
    # Vocab tile: lane-dense multiple of 128 (keeps resident W2 slice small
    # enough for v5e's 16 MiB / v7x's 64 MiB VMEM budgets at real vocab sizes).
    if tv is None:
        tv = min(512, _round_up(V, 128))

    Tp = _round_up(T, tm)
    Vp = _round_up(V, tv)

    ids = input_ids.reshape(T).astype(jnp.int32)
    mask = attention_mask.reshape(T).astype(jnp.float32)
    if Tp != T:
        ids = jnp.concatenate([ids, jnp.zeros((Tp - T,), jnp.int32)])
        mask = jnp.concatenate([mask, jnp.zeros((Tp - T,), jnp.float32)])
    mask = mask.reshape(Tp, 1)

    # bf16 weights for the MXU; biases stay f32 for the epilogue adds.
    w1_b = w1.astype(jnp.bfloat16)
    w2_p, b2_p = w2, b2
    if Vp != V:
        w2_p = jnp.pad(w2, ((0, 0), (0, Vp - V)))
        b2_p = jnp.pad(b2, (0, Vp - V))
    w2_b = w2_p.astype(jnp.bfloat16)

    grid = (Tp // tm, Vp // tv)
    kernel = functools.partial(_lm_kernel, tm=tm)

    out = pl.pallas_call(
        kernel,
        out_shape=jax.ShapeDtypeStruct((Tp, Vp), jnp.float32),
        grid_spec=pltpu.PrefetchScalarGridSpec(
            num_scalar_prefetch=1,                     # ids -> SMEM
            grid=grid,
            in_specs=[
                pl.BlockSpec(memory_space=pl.ANY),                     # emb table (HBM)
                pl.BlockSpec((E, H), lambda i, j, ids_ref: (0, 0)),    # W1 (resident)
                pl.BlockSpec((1, H), lambda i, j, ids_ref: (0, 0)),    # b1 (resident)
                pl.BlockSpec((H, tv), lambda i, j, ids_ref: (0, j)),   # W2 V-tile
                pl.BlockSpec((1, tv), lambda i, j, ids_ref: (0, j)),   # b2 V-tile
                pl.BlockSpec((tm, 1), lambda i, j, ids_ref: (i, 0)),   # mask tile
            ],
            out_specs=pl.BlockSpec((tm, tv), lambda i, j, ids_ref: (i, j)),
            scratch_shapes=[
                pltpu.VMEM((tm, E), jnp.float32),      # gathered embedding rows
                pltpu.VMEM((tm, H), jnp.bfloat16),     # cached hidden activations
                pltpu.SemaphoreType.DMA((1,)),         # row-gather DMA semaphore
            ],
        ),
        compiler_params=pltpu.CompilerParams(
            dimension_semantics=("parallel", "arbitrary")),
    )(ids, emb_table, w1_b, b1.reshape(1, H), w2_b, b2_p.reshape(1, Vp), mask)

    logits = out[:T, :V].reshape(B, S, V)
    return {"logits": logits}


def init_params(key, vocab_size, embedding_dim, hidden_dim):
    """Deterministic synthetic parameters (shapes match the PyTorch module)."""
    k_emb, k_w1, k_b1, k_w2, k_b2 = jax.random.split(key, 5)
    emb = jax.random.normal(k_emb, (vocab_size, embedding_dim), jnp.float32)
    lim1 = 1.0 / (embedding_dim ** 0.5)
    w1 = jax.random.uniform(k_w1, (embedding_dim, hidden_dim), jnp.float32,
                            -lim1, lim1)
    b1 = jax.random.uniform(k_b1, (hidden_dim,), jnp.float32, -lim1, lim1)
    lim2 = 1.0 / (hidden_dim ** 0.5)
    w2 = jax.random.uniform(k_w2, (hidden_dim, vocab_size), jnp.float32,
                            -lim2, lim2)
    b2 = jax.random.uniform(k_b2, (vocab_size,), jnp.float32, -lim2, lim2)
    return {"embedding": emb, "w1": w1, "b1": b1, "w2": w2, "b2": b2}


if __name__ == "__main__":
    # Module-default shapes (small): vocab=1000, E=256, H=512; batch=2, seq=8.
    vocab_size, embedding_dim, hidden_dim = 1000, 256, 512
    batch, seq = 2, 8

    key = jax.random.PRNGKey(0)
    k_params, k_ids, k_mask = jax.random.split(key, 3)

    params = init_params(k_params, vocab_size, embedding_dim, hidden_dim)
    input_ids = jax.random.randint(k_ids, (batch, seq), 0, vocab_size,
                                   dtype=jnp.int32)
    attention_mask = (jax.random.uniform(k_mask, (batch, seq)) > 0.25
                      ).astype(jnp.float32)

    out = language_model_forward(input_ids, attention_mask, params)
    logits = jax.block_until_ready(out["logits"])

    # Pure-JAX f32 reference of the same math (kernel uses bf16 MXU inputs with
    # f32 accumulation, so tolerances are loosened accordingly).
    emb = params["embedding"][input_ids]                          # [B, S, E]
    hid = emb @ params["w1"] + params["b1"]                       # [B, S, H]
    ref = (hid @ params["w2"] + params["b2"]) * attention_mask[..., None]

    assert logits.shape == (batch, seq, vocab_size)
    assert jnp.allclose(logits, ref, atol=5e-2, rtol=5e-2), (
        float(jnp.max(jnp.abs(logits - ref))))

    print("KERNEL_OK")
</pallas_src>

<mosaic_0001>
module attributes {stable_mosaic.version = 11 : i64} {
  func.func @_lm_kernel(%arg0: i32, %arg1: i32, %arg2: memref<16xi32, #tpu.memory_space<smem>>, %arg3: memref<1000x256xf32, #tpu.memory_space<any>>, %arg4: memref<256x512xbf16, #tpu.memory_space<vmem>>, %arg5: memref<1x512xf32, #tpu.memory_space<vmem>>, %arg6: memref<512x512xbf16, #tpu.memory_space<vmem>>, %arg7: memref<1x512xf32, #tpu.memory_space<vmem>>, %arg8: memref<8x1xf32, #tpu.memory_space<vmem>>, %arg9: memref<8x512xf32, #tpu.memory_space<vmem>>, %arg10: memref<8x256xf32, #tpu.memory_space<vmem>>, %arg11: memref<8x512xbf16, #tpu.memory_space<vmem>>, %arg12: memref<1x!tpu.dma_semaphore, #tpu.memory_space<semaphore_mem>>) attributes {dimension_semantics = [#tpu.dimension_semantics<parallel>, #tpu.dimension_semantics<arbitrary>], iteration_bounds = array<i64: 2, 2>, scalar_prefetch = 1 : i64, scratch_operands = 3 : i64, tpu.core_type = #tpu.core_type<tc>, window_params = [{}, {pipeline_mode = #tpu.pipeline_mode<synchronous>, transform_indices = @transform_1, window_bounds = array<i64: 256, 512>}, {pipeline_mode = #tpu.pipeline_mode<synchronous>, transform_indices = @transform_2, window_bounds = array<i64: 1, 512>}, {transform_indices = @transform_3, window_bounds = array<i64: 512, 512>}, {transform_indices = @transform_4, window_bounds = array<i64: 1, 512>}, {transform_indices = @transform_5, window_bounds = array<i64: 8, 1>}, {transform_indices = @transform_6, window_bounds = array<i64: 8, 512>}]} {
    %c0_i32 = arith.constant 0 : i32
    %0 = arith.cmpi eq, %arg1, %c0_i32 : i32
    %1 = arith.extui %0 : i1 to i32
    %c0_i32_0 = arith.constant 0 : i32
    %2 = arith.cmpi ne, %1, %c0_i32_0 : i32
    scf.if %2 {
      %c8_i32 = arith.constant 8 : i32
      %13 = arith.muli %arg0, %c8_i32 : i32
      %c0_i32_10 = arith.constant 0 : i32
      %14 = arith.addi %13, %c0_i32_10 : i32
      %15 = arith.index_cast %14 : i32 to index
      %16 = memref.load %arg2[%15] : memref<16xi32, #tpu.memory_space<smem>>
      %c0_i32_11 = arith.constant 0 : i32
      %c0_i32_12 = arith.constant 0 : i32
      %17 = tpu.memref_slice %arg3[%16, %c0_i32_12] : memref<1000x256xf32, #tpu.memory_space<any>> -> memref<1x256xf32, #tpu.memory_space<any>>
      %c0_i32_13 = arith.constant 0 : i32
      %18 = tpu.memref_slice %arg10[%c0_i32_10, %c0_i32_13] : memref<8x256xf32, #tpu.memory_space<vmem>> -> memref<1x256xf32, #tpu.memory_space<vmem>>
      %19 = tpu.memref_slice %arg12[%c0_i32_11] : memref<1x!tpu.dma_semaphore, #tpu.memory_space<semaphore_mem>> -> memref<1x!tpu.dma_semaphore, #tpu.memory_space<semaphore_mem>>
      %20 = tpu.memref_squeeze %19 : memref<1x!tpu.dma_semaphore, #tpu.memory_space<semaphore_mem>> -> memref<!tpu.dma_semaphore, #tpu.memory_space<semaphore_mem>>
      tpu.enqueue_dma source(%17 : memref<1x256xf32, #tpu.memory_space<any>>) target(%18 : memref<1x256xf32, #tpu.memory_space<vmem>>) target_semaphore(%20 : memref<!tpu.dma_semaphore, #tpu.memory_space<semaphore_mem>>)
      %c1_i32 = arith.constant 1 : i32
      %21 = arith.addi %13, %c1_i32 : i32
      %22 = arith.index_cast %21 : i32 to index
      %23 = memref.load %arg2[%22] : memref<16xi32, #tpu.memory_space<smem>>
      %c0_i32_14 = arith.constant 0 : i32
      %c0_i32_15 = arith.constant 0 : i32
      %24 = tpu.memref_slice %arg3[%23, %c0_i32_15] : memref<1000x256xf32, #tpu.memory_space<any>> -> memref<1x256xf32, #tpu.memory_space<any>>
      %c0_i32_16 = arith.constant 0 : i32
      %25 = tpu.memref_slice %arg10[%c1_i32, %c0_i32_16] : memref<8x256xf32, #tpu.memory_space<vmem>> -> memref<1x256xf32, #tpu.memory_space<vmem>>
      %26 = tpu.memref_slice %arg12[%c0_i32_14] : memref<1x!tpu.dma_semaphore, #tpu.memory_space<semaphore_mem>> -> memref<1x!tpu.dma_semaphore, #tpu.memory_space<semaphore_mem>>
      %27 = tpu.memref_squeeze %26 : memref<1x!tpu.dma_semaphore, #tpu.memory_space<semaphore_mem>> -> memref<!tpu.dma_semaphore, #tpu.memory_space<semaphore_mem>>
      tpu.enqueue_dma source(%24 : memref<1x256xf32, #tpu.memory_space<any>>) target(%25 : memref<1x256xf32, #tpu.memory_space<vmem>>) target_semaphore(%27 : memref<!tpu.dma_semaphore, #tpu.memory_space<semaphore_mem>>)
      %c2_i32 = arith.constant 2 : i32
      %28 = arith.addi %13, %c2_i32 : i32
      %29 = arith.index_cast %28 : i32 to index
      %30 = memref.load %arg2[%29] : memref<16xi32, #tpu.memory_space<smem>>
      %c0_i32_17 = arith.constant 0 : i32
      %c0_i32_18 = arith.constant 0 : i32
      %31 = tpu.memref_slice %arg3[%30, %c0_i32_18] : memref<1000x256xf32, #tpu.memory_space<any>> -> memref<1x256xf32, #tpu.memory_space<any>>
      %c0_i32_19 = arith.constant 0 : i32
      %32 = tpu.memref_slice %arg10[%c2_i32, %c0_i32_19] : memref<8x256xf32, #tpu.memory_space<vmem>> -> memref<1x256xf32, #tpu.memory_space<vmem>>
      %33 = tpu.memref_slice %arg12[%c0_i32_17] : memref<1x!tpu.dma_semaphore, #tpu.memory_space<semaphore_mem>> -> memref<1x!tpu.dma_semaphore, #tpu.memory_space<semaphore_mem>>
      %34 = tpu.memref_squeeze %33 : memref<1x!tpu.dma_semaphore, #tpu.memory_space<semaphore_mem>> -> memref<!tpu.dma_semaphore, #tpu.memory_space<semaphore_mem>>
      tpu.enqueue_dma source(%31 : memref<1x256xf32, #tpu.memory_space<any>>) target(%32 : memref<1x256xf32, #tpu.memory_space<vmem>>) target_semaphore(%34 : memref<!tpu.dma_semaphore, #tpu.memory_space<semaphore_mem>>)
      %c3_i32 = arith.constant 3 : i32
      %35 = arith.addi %13, %c3_i32 : i32
      %36 = arith.index_cast %35 : i32 to index
      %37 = memref.load %arg2[%36] : memref<16xi32, #tpu.memory_space<smem>>
      %c0_i32_20 = arith.constant 0 : i32
      %c0_i32_21 = arith.constant 0 : i32
      %38 = tpu.memref_slice %arg3[%37, %c0_i32_21] : memref<1000x256xf32, #tpu.memory_space<any>> -> memref<1x256xf32, #tpu.memory_space<any>>
      %c0_i32_22 = arith.constant 0 : i32
      %39 = tpu.memref_slice %arg10[%c3_i32, %c0_i32_22] : memref<8x256xf32, #tpu.memory_space<vmem>> -> memref<1x256xf32, #tpu.memory_space<vmem>>
      %40 = tpu.memref_slice %arg12[%c0_i32_20] : memref<1x!tpu.dma_semaphore, #tpu.memory_space<semaphore_mem>> -> memref<1x!tpu.dma_semaphore, #tpu.memory_space<semaphore_mem>>
      %41 = tpu.memref_squeeze %40 : memref<1x!tpu.dma_semaphore, #tpu.memory_space<semaphore_mem>> -> memref<!tpu.dma_semaphore, #tpu.memory_space<semaphore_mem>>
      tpu.enqueue_dma source(%38 : memref<1x256xf32, #tpu.memory_space<any>>) target(%39 : memref<1x256xf32, #tpu.memory_space<vmem>>) target_semaphore(%41 : memref<!tpu.dma_semaphore, #tpu.memory_space<semaphore_mem>>)
      %c4_i32 = arith.constant 4 : i32
      %42 = arith.addi %13, %c4_i32 : i32
      %43 = arith.index_cast %42 : i32 to index
      %44 = memref.load %arg2[%43] : memref<16xi32, #tpu.memory_space<smem>>
      %c0_i32_23 = arith.constant 0 : i32
      %c0_i32_24 = arith.constant 0 : i32
      %45 = tpu.memref_slice %arg3[%44, %c0_i32_24] : memref<1000x256xf32, #tpu.memory_space<any>> -> memref<1x256xf32, #tpu.memory_space<any>>
      %c0_i32_25 = arith.constant 0 : i32
      %46 = tpu.memref_slice %arg10[%c4_i32, %c0_i32_25] : memref<8x256xf32, #tpu.memory_space<vmem>> -> memref<1x256xf32, #tpu.memory_space<vmem>>
      %47 = tpu.memref_slice %arg12[%c0_i32_23] : memref<1x!tpu.dma_semaphore, #tpu.memory_space<semaphore_mem>> -> memref<1x!tpu.dma_semaphore, #tpu.memory_space<semaphore_mem>>
      %48 = tpu.memref_squeeze %47 : memref<1x!tpu.dma_semaphore, #tpu.memory_space<semaphore_mem>> -> memref<!tpu.dma_semaphore, #tpu.memory_space<semaphore_mem>>
      tpu.enqueue_dma source(%45 : memref<1x256xf32, #tpu.memory_space<any>>) target(%46 : memref<1x256xf32, #tpu.memory_space<vmem>>) target_semaphore(%48 : memref<!tpu.dma_semaphore, #tpu.memory_space<semaphore_mem>>)
      %c5_i32 = arith.constant 5 : i32
      %49 = arith.addi %13, %c5_i32 : i32
      %50 = arith.index_cast %49 : i32 to index
      %51 = memref.load %arg2[%50] : memref<16xi32, #tpu.memory_space<smem>>
      %c0_i32_26 = arith.constant 0 : i32
      %c0_i32_27 = arith.constant 0 : i32
      %52 = tpu.memref_slice %arg3[%51, %c0_i32_27] : memref<1000x256xf32, #tpu.memory_space<any>> -> memref<1x256xf32, #tpu.memory_space<any>>
      %c0_i32_28 = arith.constant 0 : i32
      %53 = tpu.memref_slice %arg10[%c5_i32, %c0_i32_28] : memref<8x256xf32, #tpu.memory_space<vmem>> -> memref<1x256xf32, #tpu.memory_space<vmem>>
      %54 = tpu.memref_slice %arg12[%c0_i32_26] : memref<1x!tpu.dma_semaphore, #tpu.memory_space<semaphore_mem>> -> memref<1x!tpu.dma_semaphore, #tpu.memory_space<semaphore_mem>>
      %55 = tpu.memref_squeeze %54 : memref<1x!tpu.dma_semaphore, #tpu.memory_space<semaphore_mem>> -> memref<!tpu.dma_semaphore, #tpu.memory_space<semaphore_mem>>
      tpu.enqueue_dma source(%52 : memref<1x256xf32, #tpu.memory_space<any>>) target(%53 : memref<1x256xf32, #tpu.memory_space<vmem>>) target_semaphore(%55 : memref<!tpu.dma_semaphore, #tpu.memory_space<semaphore_mem>>)
      %c6_i32 = arith.constant 6 : i32
      %56 = arith.addi %13, %c6_i32 : i32
      %57 = arith.index_cast %56 : i32 to index
      %58 = memref.load %arg2[%57] : memref<16xi32, #tpu.memory_space<smem>>
      %c0_i32_29 = arith.constant 0 : i32
      %c0_i32_30 = arith.constant 0 : i32
      %59 = tpu.memref_slice %arg3[%58, %c0_i32_30] : memref<1000x256xf32, #tpu.memory_space<any>> -> memref<1x256xf32, #tpu.memory_space<any>>
      %c0_i32_31 = arith.constant 0 : i32
      %60 = tpu.memref_slice %arg10[%c6_i32, %c0_i32_31] : memref<8x256xf32, #tpu.memory_space<vmem>> -> memref<1x256xf32, #tpu.memory_space<vmem>>
      %61 = tpu.memref_slice %arg12[%c0_i32_29] : memref<1x!tpu.dma_semaphore, #tpu.memory_space<semaphore_mem>> -> memref<1x!tpu.dma_semaphore, #tpu.memory_space<semaphore_mem>>
      %62 = tpu.memref_squeeze %61 : memref<1x!tpu.dma_semaphore, #tpu.memory_space<semaphore_mem>> -> memref<!tpu.dma_semaphore, #tpu.memory_space<semaphore_mem>>
      tpu.enqueue_dma source(%59 : memref<1x256xf32, #tpu.memory_space<any>>) target(%60 : memref<1x256xf32, #tpu.memory_space<vmem>>) target_semaphore(%62 : memref<!tpu.dma_semaphore, #tpu.memory_space<semaphore_mem>>)
      %c7_i32 = arith.constant 7 : i32
      %63 = arith.addi %13, %c7_i32 : i32
      %64 = arith.index_cast %63 : i32 to index
      %65 = memref.load %arg2[%64] : memref<16xi32, #tpu.memory_space<smem>>
      %c0_i32_32 = arith.constant 0 : i32
      %c0_i32_33 = arith.constant 0 : i32
      %66 = tpu.memref_slice %arg3[%65, %c0_i32_33] : memref<1000x256xf32, #tpu.memory_space<any>> -> memref<1x256xf32, #tpu.memory_space<any>>
      %c0_i32_34 = arith.constant 0 : i32
      %67 = tpu.memref_slice %arg10[%c7_i32, %c0_i32_34] : memref<8x256xf32, #tpu.memory_space<vmem>> -> memref<1x256xf32, #tpu.memory_space<vmem>>
      %68 = tpu.memref_slice %arg12[%c0_i32_32] : memref<1x!tpu.dma_semaphore, #tpu.memory_space<semaphore_mem>> -> memref<1x!tpu.dma_semaphore, #tpu.memory_space<semaphore_mem>>
      %69 = tpu.memref_squeeze %68 : memref<1x!tpu.dma_semaphore, #tpu.memory_space<semaphore_mem>> -> memref<!tpu.dma_semaphore, #tpu.memory_space<semaphore_mem>>
      tpu.enqueue_dma source(%66 : memref<1x256xf32, #tpu.memory_space<any>>) target(%67 : memref<1x256xf32, #tpu.memory_space<vmem>>) target_semaphore(%69 : memref<!tpu.dma_semaphore, #tpu.memory_space<semaphore_mem>>)
      %c8_i32_35 = arith.constant 8 : i32
      %c0_i32_36 = arith.constant 0 : i32
      %c0_i32_37 = arith.constant 0 : i32
      %c0_i32_38 = arith.constant 0 : i32
      %c0_i32_39 = arith.constant 0 : i32
      %70 = tpu.memref_slice %arg3[%c0_i32_38, %c0_i32_39] : memref<1000x256xf32, #tpu.memory_space<any>> -> memref<1x256xf32, #tpu.memory_space<any>>
      %c0_i32_40 = arith.constant 0 : i32
      %71 = tpu.memref_slice %arg10[%c0_i32_36, %c0_i32_40] : memref<8x256xf32, #tpu.memory_space<vmem>> -> memref<1x256xf32, #tpu.memory_space<vmem>>
      %72 = tpu.memref_slice %arg12[%c0_i32_37] : memref<1x!tpu.dma_semaphore, #tpu.memory_space<semaphore_mem>> -> memref<1x!tpu.dma_semaphore, #tpu.memory_space<semaphore_mem>>
      %73 = tpu.memref_squeeze %72 : memref<1x!tpu.dma_semaphore, #tpu.memory_space<semaphore_mem>> -> memref<!tpu.dma_semaphore, #tpu.memory_space<semaphore_mem>>
      tpu.wait_dma2 semaphore(%73 : memref<!tpu.dma_semaphore, #tpu.memory_space<semaphore_mem>>) src(%70 : memref<1x256xf32, #tpu.memory_space<any>>) dst(%71 : memref<1x256xf32, #tpu.memory_space<vmem>>)
      %c1_i32_41 = arith.constant 1 : i32
      %c0_i32_42 = arith.constant 0 : i32
      %c0_i32_43 = arith.constant 0 : i32
      %c0_i32_44 = arith.constant 0 : i32
      %74 = tpu.memref_slice %arg3[%c0_i32_43, %c0_i32_44] : memref<1000x256xf32, #tpu.memory_space<any>> -> memref<1x256xf32, #tpu.memory_space<any>>
      %c0_i32_45 = arith.constant 0 : i32
      %75 = tpu.memref_slice %arg10[%c1_i32_41, %c0_i32_45] : memref<8x256xf32, #tpu.memory_space<vmem>> -> memref<1x256xf32, #tpu.memory_space<vmem>>
      %76 = tpu.memref_slice %arg12[%c0_i32_42] : memref<1x!tpu.dma_semaphore, #tpu.memory_space<semaphore_mem>> -> memref<1x!tpu.dma_semaphore, #tpu.memory_space<semaphore_mem>>
      %77 = tpu.memref_squeeze %76 : memref<1x!tpu.dma_semaphore, #tpu.memory_space<semaphore_mem>> -> memref<!tpu.dma_semaphore, #tpu.memory_space<semaphore_mem>>
      tpu.wait_dma2 semaphore(%77 : memref<!tpu.dma_semaphore, #tpu.memory_space<semaphore_mem>>) src(%74 : memref<1x256xf32, #tpu.memory_space<any>>) dst(%75 : memref<1x256xf32, #tpu.memory_space<vmem>>)
      %c2_i32_46 = arith.constant 2 : i32
      %c0_i32_47 = arith.constant 0 : i32
      %c0_i32_48 = arith.constant 0 : i32
      %c0_i32_49 = arith.constant 0 : i32
      %78 = tpu.memref_slice %arg3[%c0_i32_48, %c0_i32_49] : memref<1000x256xf32, #tpu.memory_space<any>> -> memref<1x256xf32, #tpu.memory_space<any>>
      %c0_i32_50 = arith.constant 0 : i32
      %79 = tpu.memref_slice %arg10[%c2_i32_46, %c0_i32_50] : memref<8x256xf32, #tpu.memory_space<vmem>> -> memref<1x256xf32, #tpu.memory_space<vmem>>
      %80 = tpu.memref_slice %arg12[%c0_i32_47] : memref<1x!tpu.dma_semaphore, #tpu.memory_space<semaphore_mem>> -> memref<1x!tpu.dma_semaphore, #tpu.memory_space<semaphore_mem>>
      %81 = tpu.memref_squeeze %80 : memref<1x!tpu.dma_semaphore, #tpu.memory_space<semaphore_mem>> -> memref<!tpu.dma_semaphore, #tpu.memory_space<semaphore_mem>>
      tpu.wait_dma2 semaphore(%81 : memref<!tpu.dma_semaphore, #tpu.memory_space<semaphore_mem>>) src(%78 : memref<1x256xf32, #tpu.memory_space<any>>) dst(%79 : memref<1x256xf32, #tpu.memory_space<vmem>>)
      %c3_i32_51 = arith.constant 3 : i32
      %c0_i32_52 = arith.constant 0 : i32
      %c0_i32_53 = arith.constant 0 : i32
      %c0_i32_54 = arith.constant 0 : i32
      %82 = tpu.memref_slice %arg3[%c0_i32_53, %c0_i32_54] : memref<1000x256xf32, #tpu.memory_space<any>> -> memref<1x256xf32, #tpu.memory_space<any>>
      %c0_i32_55 = arith.constant 0 : i32
      %83 = tpu.memref_slice %arg10[%c3_i32_51, %c0_i32_55] : memref<8x256xf32, #tpu.memory_space<vmem>> -> memref<1x256xf32, #tpu.memory_space<vmem>>
      %84 = tpu.memref_slice %arg12[%c0_i32_52] : memref<1x!tpu.dma_semaphore, #tpu.memory_space<semaphore_mem>> -> memref<1x!tpu.dma_semaphore, #tpu.memory_space<semaphore_mem>>
      %85 = tpu.memref_squeeze %84 : memref<1x!tpu.dma_semaphore, #tpu.memory_space<semaphore_mem>> -> memref<!tpu.dma_semaphore, #tpu.memory_space<semaphore_mem>>
      tpu.wait_dma2 semaphore(%85 : memref<!tpu.dma_semaphore, #tpu.memory_space<semaphore_mem>>) src(%82 : memref<1x256xf32, #tpu.memory_space<any>>) dst(%83 : memref<1x256xf32, #tpu.memory_space<vmem>>)
      %c4_i32_56 = arith.constant 4 : i32
      %c0_i32_57 = arith.constant 0 : i32
      %c0_i32_58 = arith.constant 0 : i32
      %c0_i32_59 = arith.constant 0 : i32
      %86 = tpu.memref_slice %arg3[%c0_i32_58, %c0_i32_59] : memref<1000x256xf32, #tpu.memory_space<any>> -> memref<1x256xf32, #tpu.memory_space<any>>
      %c0_i32_60 = arith.constant 0 : i32
      %87 = tpu.memref_slice %arg10[%c4_i32_56, %c0_i32_60] : memref<8x256xf32, #tpu.memory_space<vmem>> -> memref<1x256xf32, #tpu.memory_space<vmem>>
      %88 = tpu.memref_slice %arg12[%c0_i32_57] : memref<1x!tpu.dma_semaphore, #tpu.memory_space<semaphore_mem>> -> memref<1x!tpu.dma_semaphore, #tpu.memory_space<semaphore_mem>>
      %89 = tpu.memref_squeeze %88 : memref<1x!tpu.dma_semaphore, #tpu.memory_space<semaphore_mem>> -> memref<!tpu.dma_semaphore, #tpu.memory_space<semaphore_mem>>
      tpu.wait_dma2 semaphore(%89 : memref<!tpu.dma_semaphore, #tpu.memory_space<semaphore_mem>>) src(%86 : memref<1x256xf32, #tpu.memory_space<any>>) dst(%87 : memref<1x256xf32, #tpu.memory_space<vmem>>)
      %c5_i32_61 = arith.constant 5 : i32
      %c0_i32_62 = arith.constant 0 : i32
      %c0_i32_63 = arith.constant 0 : i32
      %c0_i32_64 = arith.constant 0 : i32
      %90 = tpu.memref_slice %arg3[%c0_i32_63, %c0_i32_64] : memref<1000x256xf32, #tpu.memory_space<any>> -> memref<1x256xf32, #tpu.memory_space<any>>
      %c0_i32_65 = arith.constant 0 : i32
      %91 = tpu.memref_slice %arg10[%c5_i32_61, %c0_i32_65] : memref<8x256xf32, #tpu.memory_space<vmem>> -> memref<1x256xf32, #tpu.memory_space<vmem>>
      %92 = tpu.memref_slice %arg12[%c0_i32_62] : memref<1x!tpu.dma_semaphore, #tpu.memory_space<semaphore_mem>> -> memref<1x!tpu.dma_semaphore, #tpu.memory_space<semaphore_mem>>
      %93 = tpu.memref_squeeze %92 : memref<1x!tpu.dma_semaphore, #tpu.memory_space<semaphore_mem>> -> memref<!tpu.dma_semaphore, #tpu.memory_space<semaphore_mem>>
      tpu.wait_dma2 semaphore(%93 : memref<!tpu.dma_semaphore, #tpu.memory_space<semaphore_mem>>) src(%90 : memref<1x256xf32, #tpu.memory_space<any>>) dst(%91 : memref<1x256xf32, #tpu.memory_space<vmem>>)
      %c6_i32_66 = arith.constant 6 : i32
      %c0_i32_67 = arith.constant 0 : i32
      %c0_i32_68 = arith.constant 0 : i32
      %c0_i32_69 = arith.constant 0 : i32
      %94 = tpu.memref_slice %arg3[%c0_i32_68, %c0_i32_69] : memref<1000x256xf32, #tpu.memory_space<any>> -> memref<1x256xf32, #tpu.memory_space<any>>
      %c0_i32_70 = arith.constant 0 : i32
      %95 = tpu.memref_slice %arg10[%c6_i32_66, %c0_i32_70] : memref<8x256xf32, #tpu.memory_space<vmem>> -> memref<1x256xf32, #tpu.memory_space<vmem>>
      %96 = tpu.memref_slice %arg12[%c0_i32_67] : memref<1x!tpu.dma_semaphore, #tpu.memory_space<semaphore_mem>> -> memref<1x!tpu.dma_semaphore, #tpu.memory_space<semaphore_mem>>
      %97 = tpu.memref_squeeze %96 : memref<1x!tpu.dma_semaphore, #tpu.memory_space<semaphore_mem>> -> memref<!tpu.dma_semaphore, #tpu.memory_space<semaphore_mem>>
      tpu.wait_dma2 semaphore(%97 : memref<!tpu.dma_semaphore, #tpu.memory_space<semaphore_mem>>) src(%94 : memref<1x256xf32, #tpu.memory_space<any>>) dst(%95 : memref<1x256xf32, #tpu.memory_space<vmem>>)
      %c7_i32_71 = arith.constant 7 : i32
      %c0_i32_72 = arith.constant 0 : i32
      %c0_i32_73 = arith.constant 0 : i32
      %c0_i32_74 = arith.constant 0 : i32
      %98 = tpu.memref_slice %arg3[%c0_i32_73, %c0_i32_74] : memref<1000x256xf32, #tpu.memory_space<any>> -> memref<1x256xf32, #tpu.memory_space<any>>
      %c0_i32_75 = arith.constant 0 : i32
      %99 = tpu.memref_slice %arg10[%c7_i32_71, %c0_i32_75] : memref<8x256xf32, #tpu.memory_space<vmem>> -> memref<1x256xf32, #tpu.memory_space<vmem>>
      %100 = tpu.memref_slice %arg12[%c0_i32_72] : memref<1x!tpu.dma_semaphore, #tpu.memory_space<semaphore_mem>> -> memref<1x!tpu.dma_semaphore, #tpu.memory_space<semaphore_mem>>
      %101 = tpu.memref_squeeze %100 : memref<1x!tpu.dma_semaphore, #tpu.memory_space<semaphore_mem>> -> memref<!tpu.dma_semaphore, #tpu.memory_space<semaphore_mem>>
      tpu.wait_dma2 semaphore(%101 : memref<!tpu.dma_semaphore, #tpu.memory_space<semaphore_mem>>) src(%98 : memref<1x256xf32, #tpu.memory_space<any>>) dst(%99 : memref<1x256xf32, #tpu.memory_space<vmem>>)
      %c8_i32_76 = arith.constant 8 : i32
      %c0_77 = arith.constant 0 : index
      %c0_78 = arith.constant 0 : index
      %102 = vector.load %arg10[%c0_77, %c0_78] : memref<8x256xf32, #tpu.memory_space<vmem>>, vector<8x256xf32>
      %103 = arith.truncf %102 : vector<8x256xf32> to vector<8x256xbf16>
      %c0_79 = arith.constant 0 : index
      %c0_80 = arith.constant 0 : index
      %104 = vector.load %arg4[%c0_79, %c0_80] : memref<256x512xbf16, #tpu.memory_space<vmem>>, vector<256x512xbf16>
      %cst_81 = arith.constant dense<0.000000e+00> : vector<8x512xf32>
      %105 = tpu.matmul %103, %104, %cst_81 {dimension_numbers = #tpu.dot_dimension_numbers<[1], [0], [0], [1], [0, 0, 1, 1], [], []>} : vector<8x256xbf16>, vector<256x512xbf16>, vector<8x512xf32> -> vector<8x512xf32>
      %c0_82 = arith.constant 0 : index
      %c0_83 = arith.constant 0 : index
      %106 = vector.load %arg5[%c0_82, %c0_83] : memref<1x512xf32, #tpu.memory_space<vmem>>, vector<1x512xf32>
      %107 = vector.broadcast %106 : vector<1x512xf32> to vector<8x512xf32>
      %108 = arith.addf %105, %107 : vector<8x512xf32>
      %109 = arith.truncf %108 : vector<8x512xf32> to vector<8x512xbf16>
      %c0_84 = arith.constant 0 : index
      %c0_85 = arith.constant 0 : index
      %110 = vector.load %arg11[%c0_84, %c0_85] : memref<8x512xbf16, #tpu.memory_space<vmem>>, vector<8x512xbf16>
      tpu.vector_store %arg11[%c0_84, %c0_85], %109 {strides = array<i32>} : memref<8x512xbf16, #tpu.memory_space<vmem>>, vector<8x512xbf16>,
    } else {
    }
    %c0 = arith.constant 0 : index
    %c0_1 = arith.constant 0 : index
    %3 = vector.load %arg11[%c0, %c0_1] : memref<8x512xbf16, #tpu.memory_space<vmem>>, vector<8x512xbf16>
    %c0_2 = arith.constant 0 : index
    %c0_3 = arith.constant 0 : index
    %4 = vector.load %arg6[%c0_2, %c0_3] : memref<512x512xbf16, #tpu.memory_space<vmem>>, vector<512x512xbf16>
    %cst = arith.constant dense<0.000000e+00> : vector<8x512xf32>
    %5 = tpu.matmul %3, %4, %cst {dimension_numbers = #tpu.dot_dimension_numbers<[1], [0], [0], [1], [0, 0, 1, 1], [], []>} : vector<8x512xbf16>, vector<512x512xbf16>, vector<8x512xf32> -> vector<8x512xf32>
    %c0_4 = arith.constant 0 : index
    %c0_5 = arith.constant 0 : index
    %6 = vector.load %arg7[%c0_4, %c0_5] : memref<1x512xf32, #tpu.memory_space<vmem>>, vector<1x512xf32>
    %7 = vector.broadcast %6 : vector<1x512xf32> to vector<8x512xf32>
    %8 = arith.addf %5, %7 : vector<8x512xf32>
    %c0_6 = arith.constant 0 : index
    %c0_7 = arith.constant 0 : index
    %9 = vector.load %arg8[%c0_6, %c0_7] : memref<8x1xf32, #tpu.memory_space<vmem>>, vector<8x1xf32>
    %10 = vector.broadcast %9 : vector<8x1xf32> to vector<8x512xf32>
    %11 = arith.mulf %8, %10 : vector<8x512xf32>
    %c0_8 = arith.constant 0 : index
    %c0_9 = arith.constant 0 : index
    %12 = vector.load %arg9[%c0_8, %c0_9] : memref<8x512xf32, #tpu.memory_space<vmem>>, vector<8x512xf32>
    tpu.vector_store %arg9[%c0_8, %c0_9], %11 {strides = array<i32>} : memref<8x512xf32, #tpu.memory_space<vmem>>, vector<8x512xf32>,
    return
  }
  func.func @transform_1(%arg0: i32, %arg1: i32, %arg2: memref<16xi32, #tpu.memory_space<smem>>) -> (i32, i32) {
    %c0_i32 = arith.constant 0 : i32
    %c0_i32_0 = arith.constant 0 : i32
    %c0_i32_1 = arith.constant 0 : i32
    return %c0_i32, %c0_i32_0 : i32, i32
  }
  func.func @transform_2(%arg0: i32, %arg1: i32, %arg2: memref<16xi32, #tpu.memory_space<smem>>) -> (i32, i32) {
    %c0_i32 = arith.constant 0 : i32
    %c0_i32_0 = arith.constant 0 : i32
    %c0_i32_1 = arith.constant 0 : i32
    return %c0_i32, %c0_i32_0 : i32, i32
  }
  func.func @transform_3(%arg0: i32, %arg1: i32, %arg2: memref<16xi32, #tpu.memory_space<smem>>) -> (i32, i32) {
    %c0_i32 = arith.constant 0 : i32
    %c0_i32_0 = arith.constant 0 : i32
    return %c0_i32, %arg1 : i32, i32
  }
  func.func @transform_4(%arg0: i32, %arg1: i32, %arg2: memref<16xi32, #tpu.memory_space<smem>>) -> (i32, i32) {
    %c0_i32 = arith.constant 0 : i32
    %c0_i32_0 = arith.constant 0 : i32
    return %c0_i32, %arg1 : i32, i32
  }
  func.func @transform_5(%arg0: i32, %arg1: i32, %arg2: memref<16xi32, #tpu.memory_space<smem>>) -> (i32, i32) {
    %c0_i32 = arith.constant 0 : i32
    %c0_i32_0 = arith.constant 0 : i32
    return %arg0, %c0_i32 : i32, i32
  }
  func.func @transform_6(%arg0: i32, %arg1: i32, %arg2: memref<16xi32, #tpu.memory_space<smem>>) -> (i32, i32) {
    %c0_i32 = arith.constant 0 : i32
    return %arg0, %arg1 : i32, i32
  }
}

</mosaic_0001>

<bundles_post_ra>
// kernel: language_model_forward.1
= control target key start
LH: loop header
LB: loop body
LE: loop exit
PB: predicated region body
PF: predicated region fallthrough
CT: control target
= control target key end

     0   :  { %s4203_s0 = inlined_call_operand.vmem [shape: s32[16], index: 0, kind: input, shape index: {}]   ;;  %s4204_s1 = inlined_call_operand.vmem [shape: f32[1000,256], index: 1, kind: input, shape index: {}]   ;;  %s4205_s2 = inlined_call_operand.vmem [shape: bf16[256,512], index: 2, kind: input, shape index: {}]   ;;  %s4206_s3 = inlined_call_operand.vmem [shape: f32[1,512], index: 3, kind: input, shape index: {}]   ;;  %s4207_s4 = inlined_call_operand.vmem [shape: bf16[512,1024], index: 4, kind: input, shape index: {}]   ;;  %s4208_s5 = inlined_call_operand.vmem [shape: f32[1,1024], index: 5, kind: input, shape index: {}]   ;;  %s4209_s6 = inlined_call_operand.vmem [shape: f32[16,1], index: 6, kind: input, shape index: {}]   ;;  %s4210_s7 = inlined_call_operand.vmem [shape: f32[16,1024], index: 7, kind: output, shape index: {}]  }
   0x1   :  { %4211 = sst [smem:[#allocation18_spill]] %s4207_s4  ;;  %s12_s26 = sshll.u32 %s4203_s0, 4  ;;  %s13_s26 = int_to_ptr.vmem [resolvable:$true] %s12_s26 }
   0x2   :  { %4212 = sst [smem:[#allocation19_spill]] %s4209_s6  ;;  %s3348_s27 = scalar_lea.vmem %s13_s26, 16 }
   0x3   :  { %4213 = sst [smem:[#allocation20_spill]] %s4210_s7  ;;  %p3349_p0 = scmp.ne.s32.totalorder %s13_s26, %s3348_s27 }
   0x4   :  { %p3353_p1 = scmp.lt.s32.totalorder %s13_s26, %s13_s26  ;;  %p3354_p2 = scmp.lt.s32.totalorder %s3348_s27, %s3348_s27 }
   0x6   :  { %p3355_p3 = por %p3354_p2, %p3353_p1 }
   0x8   :  { %p3356_p4 = pnand %p3355_p3, %p3349_p0 }
   0xa   :  { %3359 = shalt.err (!%p3356_p4)  }
   0xb   :  { %s3420_s28 = smov [#allocation6]  }
   0xc   :  { %15 = dma.vmem_to_smem %s13_s26, 16, %s3420_s28, [#allocation5] }
   0xd   :  { %3388 = dma.done.wait [#allocation5], 16 }
   0xe   :  { %3389 = vsyncadd [#allocation5], 4294967280 }
   0xf   :  { %17 = sfence }
  0x10   :  { %s3465_s29 = smov 0   ;;  %s3467_s30 = smov 0  }
  0x11   :  { %s3469_s8 = smov 0   ;;  %s3471_s0 = smov 0  }
  0x12   :  { %s3473_s9 = smov 0   ;;  %s3475_s10 = smov 0  }
  0x13   :  { %s3477_s11 = smov 0  }
  0x14 LB: > { %s32_s12 = sadd.s32 1, %s3410_s9  ;;  %s35_s13 = sadd.s32 1, %s3414_s10  ;;  %s3418_s11 = sphi %s3477_s11, %s23_s11   ;;  %s3414_s10 = sphi %s3475_s10, %s4223_s10   ;;  %s3410_s9 = sphi %s3473_s9, %s4222_s9   ;;  %s3406_s0 = sphi %s3471_s0, %s4221_s0   ;;  %s3402_s8 = sphi %s3469_s8, %s4220_s8   ;;  %s3398_s30 = sphi %s3467_s30, %s4219_s30   ;;  %s3394_s29 = sphi %s3465_s29, %s4218_s29  }
  0x15   : > { %p33_p5 = scmp.ge.s32.totalorder %s32_s12, 2  ;;  %s84_s14 = sadd.s32 1, %s3398_s30 }
  0x16   : > { %p91_p6 = scmp.ne.s32.totalorder %s3398_s30, %s3394_s29  ;;  %p92_p7 = scmp.eq.s32.totalorder %s3418_s11, 0 }
  0x17   : > { %s4225_s12 = smov (%p33_p5, %s32_s12), 0  ;;  %s4227_s13 = smov (!%p33_p5, %s35_s13), %s3414_s10 }
  0x18   : > { %s81_s15 = ssub.s32 %s3410_s9, %s4225_s12  ;;  %p93_p8 = por %p92_p7, %p91_p6 }
  0x19   : > { %p37_p9 = scmp.ge.s32.totalorder %s4227_s13, 2  ;;  %p82_p10 = scmp.eq.s32.totalorder %s81_s15, 0 }
  0x1a   : > { %p2760_p11 = scmp.ge.s32.totalorder %s3418_s11, 4 }
  0x1b   : > { %s4229_s13 = smov (%p37_p9, %s4227_s13), 0 }
  0x1c   : > { %s3514_s16 = scalar_select %p82_p10, %s3398_s30, %s84_s14  }
  0x1d   : > { %203 = sbr.rel (%p2760_p11) target bundleno = 110 (0x6e), region = 24 }
  0x24   : > { %206 = sbr.rel (!%p93_p8) target bundleno = 110 (0x6e), region = 28  ;;  %s208_s17 = sand.u32 (%p93_p8), 1, %s3398_s30  }
  0x25   : > { %s2982_s18 = sshll.u32 (%p93_p8), %s3410_s9, 4  ;;  %s2761_s19 = sshll.u32 (%p93_p8), %s208_s17, 10 }
  0x26   : > { %s4214_s4 = sld [smem:[#allocation18_spill]] (%p93_p8)  ;;  %s3527_s23 = scalar_lea.vmem (%p93_p8), [#allocation7], %s2761_s19 }
  0x2c   : > { %s3522_s22 = scalar_lea.vmem %s4214_s4, %s2982_s18 }
  0x2d   : > { %v226_v0 = vld [vmem:[%s3522_s22] sm:$0xff]  ;;  %v228_v1 = vld [vmem:[%s3522_s22 + $0x8] sm:$0xff] }
  0x2e   : > { %v230_v2 = vld [vmem:[%s3522_s22 + $0x20] sm:$0xff]  ;;  %227 = vst [vmem:[%s3527_s23] sm:$0xff] %v226_v0  ;;  %229 = vst [vmem:[%s3527_s23 + $0x8] sm:$0xff] %v228_v1  ;;  %v232_v3 = vld [vmem:[%s3522_s22 + $0x28] sm:$0xff] }
  0x2f   : > { %231 = vst [vmem:[%s3527_s23 + $0x10] sm:$0xff] %v230_v2  ;;  %v234_v4 = vld [vmem:[%s3522_s22 + $0x40] sm:$0xff]  ;;  %v236_v5 = vld [vmem:[%s3522_s22 + $0x48] sm:$0xff]  ;;  %233 = vst [vmem:[%s3527_s23 + $0x18] sm:$0xff] %v232_v3 }
  0x30   : > { %235 = vst [vmem:[%s3527_s23 + $0x20] sm:$0xff] %v234_v4  ;;  %237 = vst [vmem:[%s3527_s23 + $0x28] sm:$0xff] %v236_v5  ;;  %v238_v6 = vld [vmem:[%s3522_s22 + $0x60] sm:$0xff]  ;;  %v240_v7 = vld [vmem:[%s3522_s22 + $0x68] sm:$0xff] }
  0x31   : > { %v242_v8 = vld [vmem:[%s3522_s22 + $0x80] sm:$0xff]  ;;  %239 = vst [vmem:[%s3527_s23 + $0x30] sm:$0xff] %v238_v6  ;;  %241 = vst [vmem:[%s3527_s23 + $0x38] sm:$0xff] %v240_v7  ;;  %v244_v9 = vld [vmem:[%s3522_s22 + $0x88] sm:$0xff] }
  0x32   : > { %243 = vst [vmem:[%s3527_s23 + $0x40] sm:$0xff] %v242_v8  ;;  %v246_v10 = vld [vmem:[%s3522_s22 + $0xa0] sm:$0xff]  ;;  %v248_v11 = vld [vmem:[%s3522_s22 + $0xa8] sm:$0xff]  ;;  %245 = vst [vmem:[%s3527_s23 + $0x48] sm:$0xff] %v244_v9 }
  0x33   : > { %247 = vst [vmem:[%s3527_s23 + $0x50] sm:$0xff] %v246_v10  ;;  %249 = vst [vmem:[%s3527_s23 + $0x58] sm:$0xff] %v248_v11  ;;  %v250_v12 = vld [vmem:[%s3522_s22 + $0xc0] sm:$0xff]  ;;  %v252_v13 = vld [vmem:[%s3522_s22 + $0xc8] sm:$0xff] }
  0x34   : > { %v254_v14 = vld [vmem:[%s3522_s22 + $0xe0] sm:$0xff]  ;;  %251 = vst [vmem:[%s3527_s23 + $0x60] sm:$0xff] %v250_v12  ;;  %253 = vst [vmem:[%s3527_s23 + $0x68] sm:$0xff] %v252_v13  ;;  %v256_v15 = vld [vmem:[%s3522_s22 + $0xe8] sm:$0xff] }
  0x35   : > { %255 = vst [vmem:[%s3527_s23 + $0x70] sm:$0xff] %v254_v14  ;;  %v258_v16 = vld [vmem:[%s3522_s22 + $0x100] sm:$0xff]  ;;  %v260_v17 = vld [vmem:[%s3522_s22 + $0x108] sm:$0xff]  ;;  %257 = vst [vmem:[%s3527_s23 + $0x78] sm:$0xff] %v256_v15 }
  0x36   : > { %259 = vst [vmem:[%s3527_s23 + $0x80] sm:$0xff] %v258_v16  ;;  %261 = vst [vmem:[%s3527_s23 + $0x88] sm:$0xff] %v260_v17  ;;  %v262_v18 = vld [vmem:[%s3522_s22 + $0x120] sm:$0xff]  ;;  %v264_v19 = vld [vmem:[%s3522_s22 + $0x128] sm:$0xff] }
  0x37   : > { %v266_v20 = vld [vmem:[%s3522_s22 + $0x140] sm:$0xff]  ;;  %263 = vst [vmem:[%s3527_s23 + $0x90] sm:$0xff] %v262_v18  ;;  %265 = vst [vmem:[%s3527_s23 + $0x98] sm:$0xff] %v264_v19  ;;  %v268_v21 = vld [vmem:[%s3522_s22 + $0x148] sm:$0xff] }
  0x38   : > { %267 = vst [vmem:[%s3527_s23 + $0xa0] sm:$0xff] %v266_v20  ;;  %v270_v22 = vld [vmem:[%s3522_s22 + $0x160] sm:$0xff]  ;;  %v272_v23 = vld [vmem:[%s3522_s22 + $0x168] sm:$0xff]  ;;  %269 = vst [vmem:[%s3527_s23 + $0xa8] sm:$0xff] %v268_v21 }
  0x39   : > { %271 = vst [vmem:[%s3527_s23 + $0xb0] sm:$0xff] %v270_v22  ;;  %273 = vst [vmem:[%s3527_s23 + $0xb8] sm:$0xff] %v272_v23  ;;  %v274_v24 = vld [vmem:[%s3522_s22 + $0x180] sm:$0xff]  ;;  %v276_v25 = vld [vmem:[%s3522_s22 + $0x188] sm:$0xff] }
  0x3a   : > { %v278_v26 = vld [vmem:[%s3522_s22 + $0x1a0] sm:$0xff]  ;;  %275 = vst [vmem:[%s3527_s23 + $0xc0] sm:$0xff] %v274_v24  ;;  %277 = vst [vmem:[%s3527_s23 + $0xc8] sm:$0xff] %v276_v25  ;;  %v280_v27 = vld [vmem:[%s3522_s22 + $0x1a8] sm:$0xff] }
  0x3b   : > { %279 = vst [vmem:[%s3527_s23 + $0xd0] sm:$0xff] %v278_v26  ;;  %v282_v28 = vld [vmem:[%s3522_s22 + $0x1c0] sm:$0xff]  ;;  %v284_v29 = vld [vmem:[%s3522_s22 + $0x1c8] sm:$0xff]  ;;  %281 = vst [vmem:[%s3527_s23 + $0xd8] sm:$0xff] %v280_v27 }
  0x3c   : > { %283 = vst [vmem:[%s3527_s23 + $0xe0] sm:$0xff] %v282_v28  ;;  %285 = vst [vmem:[%s3527_s23 + $0xe8] sm:$0xff] %v284_v29  ;;  %v286_v30 = vld [vmem:[%s3522_s22 + $0x1e0] sm:$0xff]  ;;  %v288_v31 = vld [vmem:[%s3522_s22 + $0x1e8] sm:$0xff] }
  0x3d   : > { %v290_v32 = vld [vmem:[%s3522_s22 + $0x200] sm:$0xff]  ;;  %287 = vst [vmem:[%s3527_s23 + $0xf0] sm:$0xff] %v286_v30  ;;  %289 = vst [vmem:[%s3527_s23 + $0xf8] sm:$0xff] %v288_v31  ;;  %v292_v33 = vld [vmem:[%s3522_s22 + $0x208] sm:$0xff] }
  0x3e   : > { %291 = vst [vmem:[%s3527_s23 + $0x100] sm:$0xff] %v290_v32  ;;  %v294_v34 = vld [vmem:[%s3522_s22 + $0x220] sm:$0xff]  ;;  %v296_v35 = vld [vmem:[%s3522_s22 + $0x228] sm:$0xff]  ;;  %293 = vst [vmem:[%s3527_s23 + $0x108] sm:$0xff] %v292_v33 }
  0x3f   : > { %295 = vst [vmem:[%s3527_s23 + $0x110] sm:$0xff] %v294_v34  ;;  %297 = vst [vmem:[%s3527_s23 + $0x118] sm:$0xff] %v296_v35  ;;  %v298_v36 = vld [vmem:[%s3522_s22 + $0x240] sm:$0xff]  ;;  %v300_v37 = vld [vmem:[%s3522_s22 + $0x248] sm:$0xff] }
  0x40   : > { %v302_v38 = vld [vmem:[%s3522_s22 + $0x260] sm:$0xff]  ;;  %299 = vst [vmem:[%s3527_s23 + $0x120] sm:$0xff] %v298_v36  ;;  %301 = vst [vmem:[%s3527_s23 + $0x128] sm:$0xff] %v300_v37  ;;  %v304_v39 = vld [vmem:[%s3522_s22 + $0x268] sm:$0xff] }
  0x41   : > { %303 = vst [vmem:[%s3527_s23 + $0x130] sm:$0xff] %v302_v38  ;;  %v306_v40 = vld [vmem:[%s3522_s22 + $0x280] sm:$0xff]  ;;  %v308_v41 = vld [vmem:[%s3522_s22 + $0x288] sm:$0xff]  ;;  %305 = vst [vmem:[%s3527_s23 + $0x138] sm:$0xff] %v304_v39 }
  0x42   : > { %307 = vst [vmem:[%s3527_s23 + $0x140] sm:$0xff] %v306_v40  ;;  %309 = vst [vmem:[%s3527_s23 + $0x148] sm:$0xff] %v308_v41  ;;  %v310_v42 = vld [vmem:[%s3522_s22 + $0x2a0] sm:$0xff]  ;;  %v312_v43 = vld [vmem:[%s3522_s22 + $0x2a8] sm:$0xff] }
  0x43   : > { %v314_v44 = vld [vmem:[%s3522_s22 + $0x2c0] sm:$0xff]  ;;  %311 = vst [vmem:[%s3527_s23 + $0x150] sm:$0xff] %v310_v42  ;;  %313 = vst [vmem:[%s3527_s23 + $0x158] sm:$0xff] %v312_v43  ;;  %v316_v45 = vld [vmem:[%s3522_s22 + $0x2c8] sm:$0xff] }
  0x44   : > { %315 = vst [vmem:[%s3527_s23 + $0x160] sm:$0xff] %v314_v44  ;;  %v318_v46 = vld [vmem:[%s3522_s22 + $0x2e0] sm:$0xff]  ;;  %v320_v47 = vld [vmem:[%s3522_s22 + $0x2e8] sm:$0xff]  ;;  %317 = vst [vmem:[%s3527_s23 + $0x168] sm:$0xff] %v316_v45 }
  0x45   : > { %319 = vst [vmem:[%s3527_s23 + $0x170] sm:$0xff] %v318_v46  ;;  %321 = vst [vmem:[%s3527_s23 + $0x178] sm:$0xff] %v320_v47  ;;  %v322_v48 = vld [vmem:[%s3522_s22 + $0x300] sm:$0xff]  ;;  %v324_v49 = vld [vmem:[%s3522_s22 + $0x308] sm:$0xff] }
  0x46   : > { %v326_v50 = vld [vmem:[%s3522_s22 + $0x320] sm:$0xff]  ;;  %323 = vst [vmem:[%s3527_s23 + $0x180] sm:$0xff] %v322_v48  ;;  %325 = vst [vmem:[%s3527_s23 + $0x188] sm:$0xff] %v324_v49  ;;  %v328_v51 = vld [vmem:[%s3522_s22 + $0x328] sm:$0xff] }
  0x47   : > { %327 = vst [vmem:[%s3527_s23 + $0x190] sm:$0xff] %v326_v50  ;;  %v330_v52 = vld [vmem:[%s3522_s22 + $0x340] sm:$0xff]  ;;  %v332_v53 = vld [vmem:[%s3522_s22 + $0x348] sm:$0xff]  ;;  %329 = vst [vmem:[%s3527_s23 + $0x198] sm:$0xff] %v328_v51 }
  0x48   : > { %331 = vst [vmem:[%s3527_s23 + $0x1a0] sm:$0xff] %v330_v52  ;;  %333 = vst [vmem:[%s3527_s23 + $0x1a8] sm:$0xff] %v332_v53  ;;  %v334_v54 = vld [vmem:[%s3522_s22 + $0x360] sm:$0xff]  ;;  %v336_v55 = vld [vmem:[%s3522_s22 + $0x368] sm:$0xff] }
  0x49   : > { %v338_v56 = vld [vmem:[%s3522_s22 + $0x380] sm:$0xff]  ;;  %335 = vst [vmem:[%s3527_s23 + $0x1b0] sm:$0xff] %v334_v54  ;;  %337 = vst [vmem:[%s3527_s23 + $0x1b8] sm:$0xff] %v336_v55  ;;  %v340_v57 = vld [vmem:[%s3522_s22 + $0x388] sm:$0xff] }
  0x4a   : > { %339 = vst [vmem:[%s3527_s23 + $0x1c0] sm:$0xff] %v338_v56  ;;  %v342_v58 = vld [vmem:[%s3522_s22 + $0x3a0] sm:$0xff]  ;;  %v344_v59 = vld [vmem:[%s3522_s22 + $0x3a8] sm:$0xff]  ;;  %341 = vst [vmem:[%s3527_s23 + $0x1c8] sm:$0xff] %v340_v57 }
  0x4b   : > { %343 = vst [vmem:[%s3527_s23 + $0x1d0] sm:$0xff] %v342_v58  ;;  %345 = vst [vmem:[%s3527_s23 + $0x1d8] sm:$0xff] %v344_v59  ;;  %v346_v60 = vld [vmem:[%s3522_s22 + $0x3c0] sm:$0xff]  ;;  %v348_v61 = vld [vmem:[%s3522_s22 + $0x3c8] sm:$0xff] }
  0x4c   : > { %v350_v62 = vld [vmem:[%s3522_s22 + $0x3e0] sm:$0xff]  ;;  %347 = vst [vmem:[%s3527_s23 + $0x1e0] sm:$0xff] %v346_v60  ;;  %349 = vst [vmem:[%s3527_s23 + $0x1e8] sm:$0xff] %v348_v61  ;;  %v352_v63 = vld [vmem:[%s3522_s22 + $0x3e8] sm:$0xff] }
  0x4d   : > { %351 = vst [vmem:[%s3527_s23 + $0x1f0] sm:$0xff] %v350_v62  ;;  %v354_v0 = vld [vmem:[%s3522_s22 + $0x400] sm:$0xff]  ;;  %v356_v1 = vld [vmem:[%s3522_s22 + $0x408] sm:$0xff]  ;;  %353 = vst [vmem:[%s3527_s23 + $0x1f8] sm:$0xff] %v352_v63 }
  0x4e   : > { %355 = vst [vmem:[%s3527_s23 + $0x200] sm:$0xff] %v354_v0  ;;  %357 = vst [vmem:[%s3527_s23 + $0x208] sm:$0xff] %v356_v1  ;;  %v358_v2 = vld [vmem:[%s3522_s22 + $0x420] sm:$0xff]  ;;  %v360_v3 = vld [vmem:[%s3522_s22 + $0x428] sm:$0xff] }
  0x4f   : > { %v362_v4 = vld [vmem:[%s3522_s22 + $0x440] sm:$0xff]  ;;  %359 = vst [vmem:[%s3527_s23 + $0x210] sm:$0xff] %v358_v2  ;;  %361 = vst [vmem:[%s3527_s23 + $0x218] sm:$0xff] %v360_v3  ;;  %v364_v5 = vld [vmem:[%s3522_s22 + $0x448] sm:$0xff] }
  0x50   : > { %363 = vst [vmem:[%s3527_s23 + $0x220] sm:$0xff] %v362_v4  ;;  %v366_v6 = vld [vmem:[%s3522_s22 + $0x460] sm:$0xff]  ;;  %v368_v7 = vld [vmem:[%s3522_s22 + $0x468] sm:$0xff]  ;;  %365 = vst [vmem:[%s3527_s23 + $0x228] sm:$0xff] %v364_v5 }
  0x51   : > { %367 = vst [vmem:[%s3527_s23 + $0x230] sm:$0xff] %v366_v6  ;;  %369 = vst [vmem:[%s3527_s23 + $0x238] sm:$0xff] %v368_v7  ;;  %v370_v8 = vld [vmem:[%s3522_s22 + $0x480] sm:$0xff]  ;;  %v372_v9 = vld [vmem:[%s3522_s22 + $0x488] sm:$0xff] }
  0x52   : > { %v374_v10 = vld [vmem:[%s3522_s22 + $0x4a0] sm:$0xff]  ;;  %371 = vst [vmem:[%s3527_s23 + $0x240] sm:$0xff] %v370_v8  ;;  %373 = vst [vmem:[%s3527_s23 + $0x248] sm:$0xff] %v372_v9  ;;  %v376_v11 = vld [vmem:[%s3522_s22 + $0x4a8] sm:$0xff] }
  0x53   : > { %375 = vst [vmem:[%s3527_s23 + $0x250] sm:$0xff] %v374_v10  ;;  %v378_v12 = vld [vmem:[%s3522_s22 + $0x4c0] sm:$0xff]  ;;  %v380_v13 = vld [vmem:[%s3522_s22 + $0x4c8] sm:$0xff]  ;;  %377 = vst [vmem:[%s3527_s23 + $0x258] sm:$0xff] %v376_v11 }
  0x54   : > { %379 = vst [vmem:[%s3527_s23 + $0x260] sm:$0xff] %v378_v12  ;;  %381 = vst [vmem:[%s3527_s23 + $0x268] sm:$0xff] %v380_v13  ;;  %v382_v14 = vld [vmem:[%s3522_s22 + $0x4e0] sm:$0xff]  ;;  %v384_v15 = vld [vmem:[%s3522_s22 + $0x4e8] sm:$0xff] }
  0x55   : > { %v386_v16 = vld [vmem:[%s3522_s22 + $0x500] sm:$0xff]  ;;  %383 = vst [vmem:[%s3527_s23 + $0x270] sm:$0xff] %v382_v14  ;;  %385 = vst [vmem:[%s3527_s23 + $0x278] sm:$0xff] %v384_v15  ;;  %v388_v17 = vld [vmem:[%s3522_s22 + $0x508] sm:$0xff] }
  0x56   : > { %387 = vst [vmem:[%s3527_s23 + $0x280] sm:$0xff] %v386_v16  ;;  %v390_v18 = vld [vmem:[%s3522_s22 + $0x520] sm:$0xff]  ;;  %v392_v19 = vld [vmem:[%s3522_s22 + $0x528] sm:$0xff]  ;;  %389 = vst [vmem:[%s3527_s23 + $0x288] sm:$0xff] %v388_v17 }
  0x57   : > { %391 = vst [vmem:[%s3527_s23 + $0x290] sm:$0xff] %v390_v18  ;;  %393 = vst [vmem:[%s3527_s23 + $0x298] sm:$0xff] %v392_v19  ;;  %v394_v20 = vld [vmem:[%s3522_s22 + $0x540] sm:$0xff]  ;;  %v396_v21 = vld [vmem:[%s3522_s22 + $0x548] sm:$0xff] }
  0x58   : > { %v398_v22 = vld [vmem:[%s3522_s22 + $0x560] sm:$0xff]  ;;  %395 = vst [vmem:[%s3527_s23 + $0x2a0] sm:$0xff] %v394_v20  ;;  %397 = vst [vmem:[%s3527_s23 + $0x2a8] sm:$0xff] %v396_v21  ;;  %v400_v23 = vld [vmem:[%s3522_s22 + $0x568] sm:$0xff] }
  0x59   : > { %399 = vst [vmem:[%s3527_s23 + $0x2b0] sm:$0xff] %v398_v22  ;;  %v402_v24 = vld [vmem:[%s3522_s22 + $0x580] sm:$0xff]  ;;  %v404_v25 = vld [vmem:[%s3522_s22 + $0x588] sm:$0xff]  ;;  %401 = vst [vmem:[%s3527_s23 + $0x2b8] sm:$0xff] %v400_v23 }
  0x5a   : > { %403 = vst [vmem:[%s3527_s23 + $0x2c0] sm:$0xff] %v402_v24  ;;  %405 = vst [vmem:[%s3527_s23 + $0x2c8] sm:$0xff] %v404_v25  ;;  %v406_v26 = vld [vmem:[%s3522_s22 + $0x5a0] sm:$0xff]  ;;  %v408_v27 = vld [vmem:[%s3522_s22 + $0x5a8] sm:$0xff] }
  0x5b   : > { %v410_v28 = vld [vmem:[%s3522_s22 + $0x5c0] sm:$0xff]  ;;  %407 = vst [vmem:[%s3527_s23 + $0x2d0] sm:$0xff] %v406_v26  ;;  %409 = vst [vmem:[%s3527_s23 + $0x2d8] sm:$0xff] %v408_v27  ;;  %v412_v29 = vld [vmem:[%s3522_s22 + $0x5c8] sm:$0xff] }
  0x5c   : > { %411 = vst [vmem:[%s3527_s23 + $0x2e0] sm:$0xff] %v410_v28  ;;  %v414_v30 = vld [vmem:[%s3522_s22 + $0x5e0] sm:$0xff]  ;;  %v416_v31 = vld [vmem:[%s3522_s22 + $0x5e8] sm:$0xff]  ;;  %413 = vst [vmem:[%s3527_s23 + $0x2e8] sm:$0xff] %v412_v29 }
  0x5d   : > { %415 = vst [vmem:[%s3527_s23 + $0x2f0] sm:$0xff] %v414_v30  ;;  %417 = vst [vmem:[%s3527_s23 + $0x2f8] sm:$0xff] %v416_v31  ;;  %v418_v32 = vld [vmem:[%s3522_s22 + $0x600] sm:$0xff]  ;;  %v420_v33 = vld [vmem:[%s3522_s22 + $0x608] sm:$0xff] }
  0x5e   : > { %v422_v34 = vld [vmem:[%s3522_s22 + $0x620] sm:$0xff]  ;;  %419 = vst [vmem:[%s3527_s23 + $0x300] sm:$0xff] %v418_v32  ;;  %421 = vst [vmem:[%s3527_s23 + $0x308] sm:$0xff] %v420_v33  ;;  %v424_v35 = vld [vmem:[%s3522_s22 + $0x628] sm:$0xff] }
  0x5f   : > { %423 = vst [vmem:[%s3527_s23 + $0x310] sm:$0xff] %v422_v34  ;;  %v426_v36 = vld [vmem:[%s3522_s22 + $0x640] sm:$0xff]  ;;  %v428_v37 = vld [vmem:[%s3522_s22 + $0x648] sm:$0xff]  ;;  %425 = vst [vmem:[%s3527_s23 + $0x318] sm:$0xff] %v424_v35 }
  0x60   : > { %427 = vst [vmem:[%s3527_s23 + $0x320] sm:$0xff] %v426_v36  ;;  %429 = vst [vmem:[%s3527_s23 + $0x328] sm:$0xff] %v428_v37  ;;  %v430_v38 = vld [vmem:[%s3522_s22 + $0x660] sm:$0xff]  ;;  %v432_v39 = vld [vmem:[%s3522_s22 + $0x668] sm:$0xff] }
  0x61   : > { %v434_v40 = vld [vmem:[%s3522_s22 + $0x680] sm:$0xff]  ;;  %431 = vst [vmem:[%s3527_s23 + $0x330] sm:$0xff] %v430_v38  ;;  %433 = vst [vmem:[%s3527_s23 + $0x338] sm:$0xff] %v432_v39  ;;  %v436_v41 = vld [vmem:[%s3522_s22 + $0x688] sm:$0xff] }
  0x62   : > { %435 = vst [vmem:[%s3527_s23 + $0x340] sm:$0xff] %v434_v40  ;;  %v438_v42 = vld [vmem:[%s3522_s22 + $0x6a0] sm:$0xff]  ;;  %v440_v43 = vld [vmem:[%s3522_s22 + $0x6a8] sm:$0xff]  ;;  %437 = vst [vmem:[%s3527_s23 + $0x348] sm:$0xff] %v436_v41 }
  0x63   : > { %439 = vst [vmem:[%s3527_s23 + $0x350] sm:$0xff] %v438_v42  ;;  %441 = vst [vmem:[%s3527_s23 + $0x358] sm:$0xff] %v440_v43  ;;  %v442_v44 = vld [vmem:[%s3522_s22 + $0x6c0] sm:$0xff]  ;;  %v444_v45 = vld [vmem:[%s3522_s22 + $0x6c8] sm:$0xff] }
  0x64   : > { %v446_v46 = vld [vmem:[%s3522_s22 + $0x6e0] sm:$0xff]  ;;  %443 = vst [vmem:[%s3527_s23 + $0x360] sm:$0xff] %v442_v44  ;;  %445 = vst [vmem:[%s3527_s23 + $0x368] sm:$0xff] %v444_v45  ;;  %v448_v47 = vld [vmem:[%s3522_s22 + $0x6e8] sm:$0xff] }
  0x65   : > { %447 = vst [vmem:[%s3527_s23 + $0x370] sm:$0xff] %v446_v46  ;;  %v450_v48 = vld [vmem:[%s3522_s22 + $0x700] sm:$0xff]  ;;  %v452_v49 = vld [vmem:[%s3522_s22 + $0x708] sm:$0xff]  ;;  %449 = vst [vmem:[%s3527_s23 + $0x378] sm:$0xff] %v448_v47 }
  0x66   : > { %451 = vst [vmem:[%s3527_s23 + $0x380] sm:$0xff] %v450_v48  ;;  %453 = vst [vmem:[%s3527_s23 + $0x388] sm:$0xff] %v452_v49  ;;  %v454_v50 = vld [vmem:[%s3522_s22 + $0x720] sm:$0xff]  ;;  %v456_v51 = vld [vmem:[%s3522_s22 + $0x728] sm:$0xff] }
  0x67   : > { %v458_v52 = vld [vmem:[%s3522_s22 + $0x740] sm:$0xff]  ;;  %455 = vst [vmem:[%s3527_s23 + $0x390] sm:$0xff] %v454_v50  ;;  %457 = vst [vmem:[%s3527_s23 + $0x398] sm:$0xff] %v456_v51  ;;  %v460_v53 = vld [vmem:[%s3522_s22 + $0x748] sm:$0xff] }
  0x68   : > { %459 = vst [vmem:[%s3527_s23 + $0x3a0] sm:$0xff] %v458_v52  ;;  %v462_v54 = vld [vmem:[%s3522_s22 + $0x760] sm:$0xff]  ;;  %v464_v55 = vld [vmem:[%s3522_s22 + $0x768] sm:$0xff]  ;;  %461 = vst [vmem:[%s3527_s23 + $0x3a8] sm:$0xff] %v460_v53 }
  0x69   : > { %463 = vst [vmem:[%s3527_s23 + $0x3b0] sm:$0xff] %v462_v54  ;;  %465 = vst [vmem:[%s3527_s23 + $0x3b8] sm:$0xff] %v464_v55  ;;  %v466_v56 = vld [vmem:[%s3522_s22 + $0x780] sm:$0xff]  ;;  %v468_v57 = vld [vmem:[%s3522_s22 + $0x788] sm:$0xff] }
  0x6a   : > { %v470_v58 = vld [vmem:[%s3522_s22 + $0x7a0] sm:$0xff]  ;;  %467 = vst [vmem:[%s3527_s23 + $0x3c0] sm:$0xff] %v466_v56  ;;  %469 = vst [vmem:[%s3527_s23 + $0x3c8] sm:$0xff] %v468_v57  ;;  %v472_v59 = vld [vmem:[%s3522_s22 + $0x7a8] sm:$0xff] }
  0x6b   : > { %471 = vst [vmem:[%s3527_s23 + $0x3d0] sm:$0xff] %v470_v58  ;;  %v474_v60 = vld [vmem:[%s3522_s22 + $0x7c0] sm:$0xff]  ;;  %v476_v61 = vld [vmem:[%s3522_s22 + $0x7c8] sm:$0xff]  ;;  %473 = vst [vmem:[%s3527_s23 + $0x3d8] sm:$0xff] %v472_v59 }
  0x6c   : > { %475 = vst [vmem:[%s3527_s23 + $0x3e0] sm:$0xff] %v474_v60  ;;  %477 = vst [vmem:[%s3527_s23 + $0x3e8] sm:$0xff] %v476_v61  ;;  %v478_v62 = vld [vmem:[%s3522_s22 + $0x7e0] sm:$0xff]  ;;  %v480_v63 = vld [vmem:[%s3522_s22 + $0x7e8] sm:$0xff] }
  0x6d   : > { %479 = vst [vmem:[%s3527_s23 + $0x3f0] sm:$0xff] %v478_v62  ;;  %481 = vst [vmem:[%s3527_s23 + $0x3f8] sm:$0xff] %v480_v63 }
  0x6e PF: > { %p2764_p12 = scmp.ge.s32.totalorder %s3418_s11, 1  ;;  %p501_p13 = scmp.lt.s32.totalorder %s3418_s11, 5 }
  0x70   : > { %p502_p0 = pnand %p2764_p12, %p501_p13 }
  0x71   : > { %s508_s24 = sand.u32 (!%p502_p0), 1, %s3394_s29   ;;  %s2766_s25 = sshll.u32 (!%p502_p0), %s3402_s8, 2 }
  0x72   : > { %505 = sbr.rel (%p502_p0) target bundleno = 859 (0x35b), region = 59  ;;  %s2765_s26 = sshll.u32 (!%p502_p0), %s508_s24, 10 }
  0x73   : > { %p549_p1 = scmp.lt.s32.totalorder (!%p502_p0), %s2766_s25, 7  ;;  %p553_p2 = scmp.lt.s32.totalorder (!%p502_p0), %s3406_s0, 1 }
  0x74   : > { %s4215_s6 = sld [smem:[#allocation19_spill]] (!%p502_p0)  ;;  %s4216_s7 = sld [smem:[#allocation20_spill]] (!%p502_p0) }
  0x75   : > { %s3805_s4 = scalar_lea.vmem (!%p502_p0), [#allocation7], %s2765_s26  ;;  %p2771_p3 = scmp.ne.s32.totalorder (!%p502_p0), %s3402_s8, 0 }
  0x79   : > { %s4231_s25 = smov (!%p549_p1, %s2766_s25), 7  ;;  %570 = sbr.rel (%p2771_p3) target bundleno = 512 (0x200), region = 67 }
  0x7a   : > { %s554_s27 = scalar_select %p553_p2, %s3406_s0, 1 }
  0x7b   : > { %s3809_s28 = sshll.u32 (!%p2771_p3), %s3406_s0, 3 }
  0x7c   : > { %s2767_s17 = sshll.u32 %s554_s27, 3  ;;  %s572_s27 = sld [smem:[#allocation6 + %s3809_s28]] (!%p2771_p3) }
  0x7d   : > { %s3797_s20 = scalar_lea.vmem %s4215_s6, %s2767_s17  ;;  %s563_s29 = sadd.s32 %s2767_s17, %s4231_s25 }
  0x7e   : > { %s2770_s21 = sshll.u32 %s563_s29, 3 }
  0x7f   : > { %s3803_s24 = scalar_lea.vmem %s4216_s7, %s2770_s21 }
  0x82   : > { %s573_s14 = sshrl.u32 %s572_s27, 3  ;;  %s574_s18 = sand.u32 7, %s572_s27  }
  0x83   : > { %s2773_s19 = sshll.u32 %s573_s14, 4 }
  0x84   : > { %s576_s17 = sadd.s32 %s2773_s19, %s574_s18 }
  0x85   : > { %s577_s22 = scalar_lea.vmem %s4204_s1, %s576_s17 }
  0x86   : > { %v595_v0 = vld [vmem:[%s577_s22] sm:$0x1]  ;;  %v597_v1 = vld [vmem:[%s577_s22 + $0x8] sm:$0x1] }
  0x87   : > { %596 = vst [vmem:[#allocation2] sm:$0x1] %v595_v0  ;;  %598 = vst [vmem:[#allocation2 + $0x8] sm:$0x1] %v597_v1 }
  0x88   : > { %625 = vsyncadd [#allocation4], 32  ;;  %s626_s8 = sadd.s32 1, %s3809_s28 }
  0x89   : > { %s627_s26 = sld [smem:[#allocation6 + %s626_s8]] }
  0x8f   : > { %s628_s0 = sshrl.u32 %s627_s26, 3  ;;  %s629_s21 = sand.u32 7, %s627_s26  }
  0x90   : > { %s2774_s23 = sshll.u32 %s628_s0, 4 }
  0x91   : > { %s631_s6 = sadd.s32 %s2774_s23, %s629_s21 }
  0x92   : > { %s632_s14 = scalar_lea.vmem %s4204_s1, %s631_s6 }
  0x93   : > { %v651_v2 = vld [vmem:[%s632_s14] sm:$0x1]  ;;  %v653_v3 = vld [vmem:[%s632_s14 + $0x8] sm:$0x1] }
  0x94   : > { %652 = vst [vmem:[#allocation2 + $0x1] sm:$0x1] %v651_v2  ;;  %654 = vst [vmem:[#allocation2 + $0x9] sm:$0x1] %v653_v3 }
  0x95   : > { %681 = vsyncadd [#allocation4], 32  ;;  %s682_s15 = sadd.s32 2, %s3809_s28 }
  0x96   : > { %s683_s18 = sld [smem:[#allocation6 + %s682_s15]] }
  0x9c   : > { %s684_s19 = sshrl.u32 %s683_s18, 3  ;;  %s685_s17 = sand.u32 7, %s683_s18  }
  0x9d   : > { %s2775_s29 = sshll.u32 %s684_s19, 4 }
  0x9e   : > { %s687_s22 = sadd.s32 %s2775_s29, %s685_s17 }
  0x9f   : > { %s688_s0 = scalar_lea.vmem %s4204_s1, %s687_s22 }
  0xa0   : > { %v707_v4 = vld [vmem:[%s688_s0] sm:$0x1]  ;;  %v709_v5 = vld [vmem:[%s688_s0 + $0x8] sm:$0x1] }
  0xa1   : > { %708 = vst [vmem:[#allocation2 + $0x2] sm:$0x1] %v707_v4  ;;  %710 = vst [vmem:[#allocation2 + $0xa] sm:$0x1] %v709_v5 }
  0xa2   : > { %737 = vsyncadd [#allocation4], 32  ;;  %s738_s6 = sadd.s32 3, %s3809_s28 }
  0xa3   : > { %s739_s7 = sld [smem:[#allocation6 + %s738_s6]] }
  0xa9   : > { %s740_s21 = sshrl.u32 %s739_s7, 3  ;;  %s741_s23 = sand.u32 7, %s739_s7  }
  0xaa   : > { %s2776_s27 = sshll.u32 %s740_s21, 4 }
  0xab   : > { %s743_s14 = sadd.s32 %s2776_s27, %s741_s23 }
  0xac   : > { %s744_s19 = scalar_lea.vmem %s4204_s1, %s743_s14 }
  0xad   : > { %v763_v6 = vld [vmem:[%s744_s19] sm:$0x1]  ;;  %v765_v7 = vld [vmem:[%s744_s19 + $0x8] sm:$0x1] }
  0xae   : > { %764 = vst [vmem:[#allocation2 + $0x3] sm:$0x1] %v763_v6  ;;  %766 = vst [vmem:[#allocation2 + $0xb] sm:$0x1] %v765_v7 }
  0xaf   : > { %793 = vsyncadd [#allocation4], 32  ;;  %s794_s17 = sadd.s32 4, %s3809_s28 }
  0xb0   : > { %s795_s29 = sld [smem:[#allocation6 + %s794_s17]] }
  0xb6   : > { %s796_s22 = sshrl.u32 %s795_s29, 3  ;;  %s797_s8 = sand.u32 7, %s795_s29  }
  0xb7   : > { %s2777_s26 = sshll.u32 %s796_s22, 4 }
  0xb8   : > { %s799_s0 = sadd.s32 %s2777_s26, %s797_s8 }
  0xb9   : > { %s800_s21 = scalar_lea.vmem %s4204_s1, %s799_s0 }
  0xba   : > { %v819_v8 = vld [vmem:[%s800_s21] sm:$0x1]  ;;  %v821_v9 = vld [vmem:[%s800_s21 + $0x8] sm:$0x1] }
  0xbb   : > { %820 = vst [vmem:[#allocation2 + $0x4] sm:$0x1] %v819_v8  ;;  %822 = vst [vmem:[#allocation2 + $0xc] sm:$0x1] %v821_v9 }
  0xbc   : > { %849 = vsyncadd [#allocation4], 32  ;;  %s850_s23 = sadd.s32 5, %s3809_s28 }
  0xbd   : > { %s851_s27 = sld [smem:[#allocation6 + %s850_s23]] }
  0xc3   : > { %s852_s14 = sshrl.u32 %s851_s27, 3  ;;  %s853_s15 = sand.u32 7, %s851_s27  }
  0xc4   : > { %s2778_s18 = sshll.u32 %s852_s14, 4 }
  0xc5   : > { %s855_s19 = sadd.s32 %s2778_s18, %s853_s15 }
  0xc6   : > { %s856_s22 = scalar_lea.vmem %s4204_s1, %s855_s19 }
  0xc7   : > { %v875_v10 = vld [vmem:[%s856_s22] sm:$0x1]  ;;  %v877_v11 = vld [vmem:[%s856_s22 + $0x8] sm:$0x1] }
  0xc8   : > { %876 = vst [vmem:[#allocation2 + $0x5] sm:$0x1] %v875_v10  ;;  %878 = vst [vmem:[#allocation2 + $0xd] sm:$0x1] %v877_v11 }
  0xc9   : > { %905 = vsyncadd [#allocation4], 32  ;;  %s906_s8 = sadd.s32 6, %s3809_s28 }
  0xca   : > { %s907_s26 = sld [smem:[#allocation6 + %s906_s8]] }
  0xd0   : > { %s908_s0 = sshrl.u32 %s907_s26, 3  ;;  %s909_s6 = sand.u32 7, %s907_s26  }
  0xd1   : > { %s2779_s7 = sshll.u32 %s908_s0, 4 }
  0xd2   : > { %s911_s21 = sadd.s32 %s2779_s7, %s909_s6 }
  0xd3   : > { %s912_s14 = scalar_lea.vmem %s4204_s1, %s911_s21 }
  0xd4   : > { %v931_v12 = vld [vmem:[%s912_s14] sm:$0x1]  ;;  %v933_v13 = vld [vmem:[%s912_s14 + $0x8] sm:$0x1] }
  0xd5   : > { %932 = vst [vmem:[#allocation2 + $0x6] sm:$0x1] %v931_v12  ;;  %934 = vst [vmem:[#allocation2 + $0xe] sm:$0x1] %v933_v13 }
  0xd6   : > { %961 = vsyncadd [#allocation4], 32  ;;  %s962_s15 = sadd.s32 7, %s3809_s28 }
  0xd7   : > { %s963_s18 = sld [smem:[#allocation6 + %s962_s15]] }
  0xdd   : > { %s964_s19 = sshrl.u32 %s963_s18, 3  ;;  %s965_s17 = sand.u32 7, %s963_s18  }
  0xde   : > { %s2780_s29 = sshll.u32 %s964_s19, 4 }
  0xdf   : > { %s967_s22 = sadd.s32 %s2780_s29, %s965_s17 }
  0xe0   : > { %s968_s0 = scalar_lea.vmem %s4204_s1, %s967_s22 }
  0xe1   : > { %v987_v14 = vld [vmem:[%s968_s0] sm:$0x1]  ;;  %v989_v15 = vld [vmem:[%s968_s0 + $0x8] sm:$0x1] }
  0xe2   : > { %988 = vst [vmem:[#allocation2 + $0x7] sm:$0x1] %v987_v14  ;;  %990 = vst [vmem:[#allocation2 + $0xf] sm:$0x1] %v989_v15 }
  0xe3   : > { %1017 = vsyncadd [#allocation4], 32 }
  0xe4   : > { %3390 = dma.done.wait [#allocation4], 256 }
  0xe5   : > { %3391 = vsyncadd [#allocation4], 4294967040  ;;  %v3055_v16 = vld [vmem:[%s4205_s2 + $0x4] ss:$16 sps:$4 sm:$0xff]   ;;  %v3057_v17 = vld [vmem:[%s4205_s2 + $0xc] ss:$16 sps:$4 sm:$0xff]  }
  0xe6   : > { %1445 = vmatprep.subr.bf16.mxu0 %v3055_v16  ;;  %v3059_v18 = vld [vmem:[%s4205_s2] ss:$16 sps:$4 sm:$0xff]   ;;  %v3060_v19 = vld [vmem:[%s4205_s2 + $0x8] ss:$16 sps:$4 sm:$0xff]   ;;  %1486 = vmatprep.subr.bf16.mxu1 %v3057_v17  ;;  %v3061_v20 = vld [vmem:[%s4205_s2 + $0x24] ss:$16 sps:$4 sm:$0xff]  }
  0xe7   : > { %1446 = vmatpush1.bf16.msra.mxu0 %v3059_v18  ;;  %1487 = vmatpush1.bf16.msra.mxu1 %v3060_v19  ;;  %v3063_v21 = vld [vmem:[%s4205_s2 + $0x2c] ss:$16 sps:$4 sm:$0xff]   ;;  %v3065_v22 = vld [vmem:[%s4205_s2 + $0x20] ss:$16 sps:$4 sm:$0xff]   ;;  %v3066_v23 = vld [vmem:[%s4205_s2 + $0x28] ss:$16 sps:$4 sm:$0xff]  }
  0xe8   : > { %1447 = vmatprep.subr.bf16.mxu0 %v3061_v20  ;;  %1488 = vmatprep.subr.bf16.mxu1 %v3063_v21  ;;  %v3067_v24 = vld [vmem:[%s4205_s2 + $0x44] ss:$16 sps:$4 sm:$0xff]   ;;  %v3069_v25 = vld [vmem:[%s4205_s2 + $0x4c] ss:$16 sps:$4 sm:$0xff]   ;;  %v3071_v26 = vld [vmem:[%s4205_s2 + $0x40] ss:$16 sps:$4 sm:$0xff]   ;;  %v1105_v20 = vlaneseq }
  0xe9   : > { %v3072_v27 = vld [vmem:[%s4205_s2 + $0x48] ss:$16 sps:$4 sm:$0xff]   ;;  %v3073_v28 = vld [vmem:[%s4205_s2 + $0x64] ss:$16 sps:$4 sm:$0xff]   ;;  %v3075_v29 = vld [vmem:[%s4205_s2 + $0x6c] ss:$16 sps:$4 sm:$0xff]  }
  0xea   : > { %v3077_v30 = vld [vmem:[%s4205_s2 + $0x60] ss:$16 sps:$4 sm:$0xff]   ;;  %v3078_v31 = vld [vmem:[%s4205_s2 + $0x68] ss:$16 sps:$4 sm:$0xff]   ;;  %v3079_v32 = vld [vmem:[%s4205_s2 + $0x84] ss:$16 sps:$4 sm:$0xff]  }
  0xeb   : > { %1448 = vmatpush1.bf16.msra.mxu0 %v3065_v22  ;;  %1489 = vmatpush1.bf16.msra.mxu1 %v3066_v23  ;;  %v3081_v33 = vld [vmem:[%s4205_s2 + $0x8c] ss:$16 sps:$4 sm:$0xff]   ;;  %v3083_v34 = vld [vmem:[%s4205_s2 + $0x80] ss:$16 sps:$4 sm:$0xff]   ;;  %v3084_v35 = vld [vmem:[%s4205_s2 + $0x88] ss:$16 sps:$4 sm:$0xff]  }
  0xec   : > { %1449 = vmatprep.subr.bf16.mxu0 %v3067_v24  ;;  %1490 = vmatprep.subr.bf16.mxu1 %v3069_v25  ;;  %v3085_v36 = vld [vmem:[%s4205_s2 + $0xa4] ss:$16 sps:$4 sm:$0xff]   ;;  %v3087_v37 = vld [vmem:[%s4205_s2 + $0xac] ss:$16 sps:$4 sm:$0xff]   ;;  %v3089_v38 = vld [vmem:[%s4205_s2 + $0xa0] ss:$16 sps:$4 sm:$0xff]  }
  0xed   : > { %v3090_v39 = vld [vmem:[%s4205_s2 + $0xa8] ss:$16 sps:$4 sm:$0xff]   ;;  %v3091_v40 = vld [vmem:[%s4205_s2 + $0xc4] ss:$16 sps:$4 sm:$0xff]   ;;  %v3093_v41 = vld [vmem:[%s4205_s2 + $0xcc] ss:$16 sps:$4 sm:$0xff]  }
  0xee   : > { %v3095_v42 = vld [vmem:[%s4205_s2 + $0xc0] ss:$16 sps:$4 sm:$0xff]   ;;  %v3096_v43 = vld [vmem:[%s4205_s2 + $0xc8] ss:$16 sps:$4 sm:$0xff]   ;;  %v3097_v44 = vld [vmem:[%s4205_s2 + $0xe4] ss:$16 sps:$4 sm:$0xff]  }
  0xef   : > { %1450 = vmatpush1.bf16.msra.mxu0 %v3071_v26  ;;  %1491 = vmatpush1.bf16.msra.mxu1 %v3072_v27  ;;  %v3099_v45 = vld [vmem:[%s4205_s2 + $0xec] ss:$16 sps:$4 sm:$0xff]   ;;  %v3101_v46 = vld [vmem:[%s4205_s2 + $0xe0] ss:$16 sps:$4 sm:$0xff]   ;;  %v3102_v47 = vld [vmem:[%s4205_s2 + $0xe8] ss:$16 sps:$4 sm:$0xff]  }
  0xf0   : > { %1451 = vmatprep.subr.bf16.mxu0 %v3073_v28  ;;  %1492 = vmatprep.subr.bf16.mxu1 %v3075_v29  ;;  %v3103_v48 = vld [vmem:[%s4205_s2 + $0x104] ss:$16 sps:$4 sm:$0xff]   ;;  %v3105_v49 = vld [vmem:[%s4205_s2 + $0x10c] ss:$16 sps:$4 sm:$0xff]   ;;  %v3107_v50 = vld [vmem:[%s4205_s2 + $0x100] ss:$16 sps:$4 sm:$0xff]  }
  0xf1   : > { %v3108_v51 = vld [vmem:[%s4205_s2 + $0x108] ss:$16 sps:$4 sm:$0xff]   ;;  %v3109_v52 = vld [vmem:[%s4205_s2 + $0x124] ss:$16 sps:$4 sm:$0xff]   ;;  %v3111_v53 = vld [vmem:[%s4205_s2 + $0x12c] ss:$16 sps:$4 sm:$0xff]  }
  0xf2   : > { %v3113_v54 = vld [vmem:[%s4205_s2 + $0x120] ss:$16 sps:$4 sm:$0xff]   ;;  %v3114_v55 = vld [vmem:[%s4205_s2 + $0x128] ss:$16 sps:$4 sm:$0xff]   ;;  %v3115_v56 = vld [vmem:[%s4205_s2 + $0x144] ss:$16 sps:$4 sm:$0xff]  }
  0xf3   : > { %1452 = vmatpush1.bf16.msra.mxu0 %v3077_v30  ;;  %1493 = vmatpush1.bf16.msra.mxu1 %v3078_v31  ;;  %v3117_v57 = vld [vmem:[%s4205_s2 + $0x14c] ss:$16 sps:$4 sm:$0xff]   ;;  %v3119_v58 = vld [vmem:[%s4205_s2 + $0x140] ss:$16 sps:$4 sm:$0xff]   ;;  %v3120_v59 = vld [vmem:[%s4205_s2 + $0x148] ss:$16 sps:$4 sm:$0xff]  }
  0xf4   : > { %1453 = vmatprep.subr.bf16.mxu0 %v3079_v32  ;;  %1494 = vmatprep.subr.bf16.mxu1 %v3081_v33  ;;  %v3121_v60 = vld [vmem:[%s4205_s2 + $0x164] ss:$16 sps:$4 sm:$0xff]   ;;  %v3123_v61 = vld [vmem:[%s4205_s2 + $0x16c] ss:$16 sps:$4 sm:$0xff]   ;;  %v3125_v0 = vld [vmem:[%s4205_s2 + $0x160] ss:$16 sps:$4 sm:$0xff]  }
  0xf5   : > { %v1036_v62 = vld [vmem:[#allocation2 + $0x8] sm:$0xff]  ;;  %v3127_v2 = vld [vmem:[%s4205_s2 + $0x184] ss:$16 sps:$4 sm:$0xff]   ;;  %v3131_v4 = vld [vmem:[%s4205_s2 + $0x180] ss:$16 sps:$4 sm:$0xff]   ;;  %v1106_v21 = vshrl.u32 %v1105_v20, 7 }
  0xf6   : > { %v1038_v63 = vpack.c.bf16 %v1036_v62, %v1036_v62  ;;  %v3126_v1 = vld [vmem:[%s4205_s2 + $0x168] ss:$16 sps:$4 sm:$0xff]   ;;  %v3129_v3 = vld [vmem:[%s4205_s2 + $0x18c] ss:$16 sps:$4 sm:$0xff]   ;;  %v3133_v6 = vld [vmem:[%s4205_s2 + $0x1a4] ss:$16 sps:$4 sm:$0xff]  }
  0xf7   : > { %1454 = vmatpush1.bf16.msra.mxu0 %v3083_v34  ;;  %1495 = vmatpush1.bf16.msra.mxu1 %v3084_v35  ;;  %v3132_v5 = vld [vmem:[%s4205_s2 + $0x188] ss:$16 sps:$4 sm:$0xff]   ;;  %v3135_v7 = vld [vmem:[%s4205_s2 + $0x1ac] ss:$16 sps:$4 sm:$0xff]   ;;  %v3137_v8 = vld [vmem:[%s4205_s2 + $0x1a0] ss:$16 sps:$4 sm:$0xff]  }
  0xf8   : > { %1455 = vmatprep.subr.bf16.mxu0 %v3085_v36  ;;  %1496 = vmatprep.subr.bf16.mxu1 %v3087_v37  ;;  %v3138_v9 = vld [vmem:[%s4205_s2 + $0x1a8] ss:$16 sps:$4 sm:$0xff]   ;;  %v3139_v10 = vld [vmem:[%s4205_s2 + $0x1c4] ss:$16 sps:$4 sm:$0xff]   ;;  %v3141_v11 = vld [vmem:[%s4205_s2 + $0x1cc] ss:$16 sps:$4 sm:$0xff]  }
  0xf9   : > { %1477 = vmatprep.mubr.bf16.mxu0 %v1038_v63  ;;  %1518 = vmatprep.mubr.bf16.mxu1 %v1038_v63  ;;  %v3143_v12 = vld [vmem:[%s4205_s2 + $0x1c0] ss:$16 sps:$4 sm:$0xff]   ;;  %v3144_v13 = vld [vmem:[%s4205_s2 + $0x1c8] ss:$16 sps:$4 sm:$0xff]   ;;  %v3145_v14 = vld [vmem:[%s4205_s2 + $0x1e4] ss:$16 sps:$4 sm:$0xff]  }
  0xfa   : > { %v3147_v15 = vld [vmem:[%s4205_s2 + $0x1ec] ss:$16 sps:$4 sm:$0xff]   ;;  %v3149_v16 = vld [vmem:[%s4205_s2 + $0x1e0] ss:$16 sps:$4 sm:$0xff]   ;;  %v3150_v17 = vld [vmem:[%s4205_s2 + $0x1e8] ss:$16 sps:$4 sm:$0xff]  }
  0xfb   : > { %1456 = vmatpush1.bf16.msra.mxu0 %v3089_v38  ;;  %1497 = vmatpush1.bf16.msra.mxu1 %v3090_v39  ;;  %v1035_v18 = vld [vmem:[#allocation2] sm:$0xff]  ;;  %v1107_v22 = vsub.s32 0, %v1106_v21  ;;  %v1115_v23 = vsub.s32 2, %v1106_v21  ;;  %v1111_v25 = vsub.s32 1, %v1106_v21  ;;  %v1119_v26 = vsub.s32 3, %v1106_v21 }
  0xfc   : > { %1457 = vmatprep.subr.bf16.mxu0 %v3091_v40  ;;  %1498 = vmatprep.subr.bf16.mxu1 %v3093_v41  ;;  %v1037_v19 = vpack.c.bf16 %v1035_v18, %v1035_v18  ;;  %v1103_v24 = vld [vmem:[%s4206_s3] sm:$0xf] }
  0xfd   : > { %v1108_v27 = vrot.slane %v1103_v24, %v1107_v22  ;;  %v1116_v28 = vrot.slane %v1103_v24, %v1115_v23  ;;  %v1112_v29 = vrot.slane %v1103_v24, %v1111_v25  ;;  %v1120_v30 = vrot.slane %v1103_v24, %v1119_v26 }
  0xff   : > { %1458 = vmatpush1.bf16.msra.mxu0 %v3095_v42  ;;  %1499 = vmatpush1.bf16.msra.mxu1 %v3096_v43 }
 0x100   : > { %1459 = vmatprep.subr.bf16.mxu0 %v3097_v44  ;;  %1500 = vmatprep.subr.bf16.mxu1 %v3099_v45 }
 0x103   : > { %1460 = vmatpush1.bf16.msra.mxu0 %v3101_v46  ;;  %1501 = vmatpush1.bf16.msra.mxu1 %v3102_v47 }
 0x104   : > { %1461 = vmatprep.subr.bf16.mxu0 %v3103_v48  ;;  %1502 = vmatprep.subr.bf16.mxu1 %v3105_v49 }
 0x107   : > { %1462 = vmatpush1.bf16.msra.mxu0 %v3107_v50  ;;  %1503 = vmatpush1.bf16.msra.mxu1 %v3108_v51 }
 0x108   : > { %1463 = vmatprep.subr.bf16.mxu0 %v3109_v52  ;;  %1504 = vmatprep.subr.bf16.mxu1 %v3111_v53 }
 0x10b   : > { %1464 = vmatpush1.bf16.msra.mxu0 %v3113_v54  ;;  %1505 = vmatpush1.bf16.msra.mxu1 %v3114_v55 }
 0x10c   : > { %1465 = vmatprep.subr.bf16.mxu0 %v3115_v56  ;;  %1506 = vmatprep.subr.bf16.mxu1 %v3117_v57 }
 0x10f   : > { %1466 = vmatpush1.bf16.msra.mxu0 %v3119_v58  ;;  %1507 = vmatpush1.bf16.msra.mxu1 %v3120_v59 }
 0x110   : > { %1467 = vmatprep.subr.bf16.mxu0 %v3121_v60  ;;  %1508 = vmatprep.subr.bf16.mxu1 %v3123_v61 }
 0x113   : > { %1468 = vmatpush1.bf16.msra.mxu0 %v3125_v0  ;;  %1509 = vmatpush1.bf16.msra.mxu1 %v3126_v1 }
 0x114   : > { %1469 = vmatprep.subr.bf16.mxu0 %v3127_v2  ;;  %1510 = vmatprep.subr.bf16.mxu1 %v3129_v3 }
 0x117   : > { %1470 = vmatpush1.bf16.msra.mxu0 %v3131_v4  ;;  %1511 = vmatpush1.bf16.msra.mxu1 %v3132_v5 }
 0x118   : > { %1471 = vmatprep.subr.bf16.mxu0 %v3133_v6  ;;  %1512 = vmatprep.subr.bf16.mxu1 %v3135_v7 }
 0x11b   : > { %1472 = vmatpush1.bf16.msra.mxu0 %v3137_v8  ;;  %1513 = vmatpush1.bf16.msra.mxu1 %v3138_v9 }
 0x11c   : > { %1473 = vmatprep.subr.bf16.mxu0 %v3139_v10  ;;  %1514 = vmatprep.subr.bf16.mxu1 %v3141_v11 }
 0x11f   : > { %1474 = vmatpush1.bf16.msra.mxu0 %v3143_v12  ;;  %1515 = vmatpush1.bf16.msra.mxu1 %v3144_v13 }
 0x120   : > { %1475 = vmatprep.subr.bf16.mxu0 %v3145_v14  ;;  %1516 = vmatprep.subr.bf16.mxu1 %v3147_v15 }
 0x123   : > { %1476 = vmatpush1.bf16.msra.mxu0 %v3149_v16  ;;  %1517 = vmatpush1.bf16.msra.mxu1 %v3150_v17 }
 0x126   : > { %1478 = vmatmul.mubr.bf16.vlgmr.msra.gmra.mrb[0].mxu0 %v1037_v19  ;;  %1519 = vmatmul.mubr.bf16.vlgmr.msra.gmra.mrb[0].mxu1 %v1037_v19 }
 0x1f9   : > { %v1479_v31 = vpop.f32.mrb[0].mxu0  ;;  %v1520_v32 = vpop.f32.mrb[0].mxu1 }
 0x1fa   : > { %v1480_v33 = vadd.f32 %v1479_v31, %v1108_v27  ;;  %v1521_v34 = vadd.f32 %v1520_v32, %v1116_v28  ;;  %v1481_v35 = vpop.f32.mrb[1].mxu0  ;;  %v1522_v36 = vpop.f32.mrb[1].mxu1 }
 0x1fb   : > { %v1482_v37 = vadd.f32 %v1481_v35, %v1112_v29  ;;  %v1523_v38 = vadd.f32 %v1522_v36, %v1120_v30  ;;  %v1483_v39 = vpop.f32.mrb[2].mxu0  ;;  %v1524_v40 = vpop.f32.mrb[2].mxu1 }
 0x1fc   : > { %v1484_v41 = vpop.f32.mrb[3].mxu0  ;;  %v1525_v42 = vpop.f32.mrb[3].mxu1 }
 0x1fd   : > { %v2983_v43 = vpack.c.bf16 %v1482_v37, %v1480_v33  ;;  %v2984_v44 = vpack.c.bf16 %v1523_v38, %v1521_v34 }
 0x1ff   : > { %1543 = vst [vmem:[#allocation3] sm:$0xff] %v2983_v43  ;;  %1544 = vst [vmem:[#allocation3 + $0x8] sm:$0xff] %v2984_v44 }
 0x200 PF: > { %v3152_v45 = vld [vmem:[%s3805_s4 + $0x4] ss:$16 sps:$4 sm:$0xff]   ;;  %v3154_v46 = vld [vmem:[%s3805_s4 + $0xc] ss:$16 sps:$4 sm:$0xff]   ;;  %v3156_v47 = vld [vmem:[%s3805_s4] ss:$16 sps:$4 sm:$0xff]   ;;  %s4217_s21 = scalar_lea.vmem %s4208_s5, %s4231_s25 }
 0x201   : > { %2351 = vmatprep.subr.bf16.mxu0 %v3152_v45  ;;  %v3157_v48 = vld [vmem:[%s3805_s4 + $0x8] ss:$16 sps:$4 sm:$0xff]   ;;  %2433 = vmatprep.subr.bf16.mxu1 %v3154_v46  ;;  %v3158_v49 = vld [vmem:[%s3805_s4 + $0x24] ss:$16 sps:$4 sm:$0xff]   ;;  %v3160_v50 = vld [vmem:[%s3805_s4 + $0x2c] ss:$16 sps:$4 sm:$0xff]  }
 0x202   : > { %2352 = vmatpush1.bf16.msra.mxu0 %v3156_v47  ;;  %2434 = vmatpush1.bf16.msra.mxu1 %v3157_v48  ;;  %v3162_v51 = vld [vmem:[%s3805_s4 + $0x20] ss:$16 sps:$4 sm:$0xff]   ;;  %v3163_v52 = vld [vmem:[%s3805_s4 + $0x28] ss:$16 sps:$4 sm:$0xff]   ;;  %v3421_v53 = vmov 0  }
 0x203   : > { %2353 = vmatprep.subr.bf16.mxu0 %v3158_v49  ;;  %3151 = vset.pattern.permute.xlu0 %v3421_v53  ;;  %v3164_v54 = vld [vmem:[%s3805_s4 + $0x44] ss:$16 sps:$4 sm:$0xff]   ;;  %v3166_v55 = vld [vmem:[%s3805_s4 + $0x4c] ss:$16 sps:$4 sm:$0xff]   ;;  %v3168_v56 = vld [vmem:[%s3805_s4 + $0x40] ss:$16 sps:$4 sm:$0xff]  }
 0x204   : > { %2435 = vmatprep.subr.bf16.mxu1 %v3160_v50  ;;  %v3169_v57 = vld [vmem:[%s3805_s4 + $0x48] ss:$16 sps:$4 sm:$0xff]   ;;  %v3170_v58 = vld [vmem:[%s3805_s4 + $0x64] ss:$16 sps:$4 sm:$0xff]   ;;  %v3172_v59 = vld [vmem:[%s3805_s4 + $0x6c] ss:$16 sps:$4 sm:$0xff]  }
 0x205   : > { %v3174_v60 = vld [vmem:[%s3805_s4 + $0x60] ss:$16 sps:$4 sm:$0xff]   ;;  %v3175_v61 = vld [vmem:[%s3805_s4 + $0x68] ss:$16 sps:$4 sm:$0xff]   ;;  %v3176_v62 = vld [vmem:[%s3805_s4 + $0x84] ss:$16 sps:$4 sm:$0xff]  }
 0x206   : > { %2354 = vmatpush1.bf16.msra.mxu0 %v3162_v51  ;;  %2436 = vmatpush1.bf16.msra.mxu1 %v3163_v52  ;;  %v3178_v63 = vld [vmem:[%s3805_s4 + $0x8c] ss:$16 sps:$4 sm:$0xff]   ;;  %v3180_v0 = vld [vmem:[%s3805_s4 + $0x80] ss:$16 sps:$4 sm:$0xff]   ;;  %v3181_v1 = vld [vmem:[%s3805_s4 + $0x88] ss:$16 sps:$4 sm:$0xff]  }
 0x207   : > { %2355 = vmatprep.subr.bf16.mxu0 %v3164_v54  ;;  %2437 = vmatprep.subr.bf16.mxu1 %v3166_v55  ;;  %v3182_v2 = vld [vmem:[%s3805_s4 + $0xa4] ss:$16 sps:$4 sm:$0xff]   ;;  %v3184_v3 = vld [vmem:[%s3805_s4 + $0xac] ss:$16 sps:$4 sm:$0xff]   ;;  %v3186_v4 = vld [vmem:[%s3805_s4 + $0xa0] ss:$16 sps:$4 sm:$0xff]  }
 0x208   : > { %v3187_v5 = vld [vmem:[%s3805_s4 + $0xa8] ss:$16 sps:$4 sm:$0xff]   ;;  %v3188_v6 = vld [vmem:[%s3805_s4 + $0xc4] ss:$16 sps:$4 sm:$0xff]   ;;  %v3190_v7 = vld [vmem:[%s3805_s4 + $0xcc] ss:$16 sps:$4 sm:$0xff]  }
 0x209   : > { %v3192_v8 = vld [vmem:[%s3805_s4 + $0xc0] ss:$16 sps:$4 sm:$0xff]   ;;  %v3193_v9 = vld [vmem:[%s3805_s4 + $0xc8] ss:$16 sps:$4 sm:$0xff]   ;;  %v3194_v10 = vld [vmem:[%s3805_s4 + $0xe4] ss:$16 sps:$4 sm:$0xff]  }
 0x20a   : > { %2356 = vmatpush1.bf16.msra.mxu0 %v3168_v56  ;;  %2438 = vmatpush1.bf16.msra.mxu1 %v3169_v57  ;;  %v3196_v11 = vld [vmem:[%s3805_s4 + $0xec] ss:$16 sps:$4 sm:$0xff]   ;;  %v3198_v12 = vld [vmem:[%s3805_s4 + $0xe0] ss:$16 sps:$4 sm:$0xff]   ;;  %v3199_v13 = vld [vmem:[%s3805_s4 + $0xe8] ss:$16 sps:$4 sm:$0xff]  }
 0x20b   : > { %2357 = vmatprep.subr.bf16.mxu0 %v3170_v58  ;;  %2439 = vmatprep.subr.bf16.mxu1 %v3172_v59  ;;  %v3200_v14 = vld [vmem:[%s3805_s4 + $0x104] ss:$16 sps:$4 sm:$0xff]   ;;  %v3202_v15 = vld [vmem:[%s3805_s4 + $0x10c] ss:$16 sps:$4 sm:$0xff]   ;;  %v3204_v16 = vld [vmem:[%s3805_s4 + $0x100] ss:$16 sps:$4 sm:$0xff]  }
 0x20c   : > { %v3205_v17 = vld [vmem:[%s3805_s4 + $0x108] ss:$16 sps:$4 sm:$0xff]   ;;  %v3206_v18 = vld [vmem:[%s3805_s4 + $0x124] ss:$16 sps:$4 sm:$0xff]   ;;  %v3208_v19 = vld [vmem:[%s3805_s4 + $0x12c] ss:$16 sps:$4 sm:$0xff]  }
 0x20d   : > { %v3210_v20 = vld [vmem:[%s3805_s4 + $0x120] ss:$16 sps:$4 sm:$0xff]   ;;  %v3211_v21 = vld [vmem:[%s3805_s4 + $0x128] ss:$16 sps:$4 sm:$0xff]   ;;  %v3212_v22 = vld [vmem:[%s3805_s4 + $0x144] ss:$16 sps:$4 sm:$0xff]  }
 0x20e   : > { %2358 = vmatpush1.bf16.msra.mxu0 %v3174_v60  ;;  %2440 = vmatpush1.bf16.msra.mxu1 %v3175_v61  ;;  %v3214_v23 = vld [vmem:[%s3805_s4 + $0x14c] ss:$16 sps:$4 sm:$0xff]   ;;  %v3216_v24 = vld [vmem:[%s3805_s4 + $0x140] ss:$16 sps:$4 sm:$0xff]   ;;  %v3217_v25 = vld [vmem:[%s3805_s4 + $0x148] ss:$16 sps:$4 sm:$0xff]  }
 0x20f   : > { %2359 = vmatprep.subr.bf16.mxu0 %v3176_v62  ;;  %2441 = vmatprep.subr.bf16.mxu1 %v3178_v63  ;;  %v3218_v26 = vld [vmem:[%s3805_s4 + $0x164] ss:$16 sps:$4 sm:$0xff]   ;;  %v3220_v27 = vld [vmem:[%s3805_s4 + $0x16c] ss:$16 sps:$4 sm:$0xff]   ;;  %v3222_v29 = vld [vmem:[%s3805_s4 + $0x160] ss:$16 sps:$4 sm:$0xff]  }
 0x210   : > { %v1545_v28 = vld [vmem:[#allocation3] sm:$0xff]  ;;  %v3223_v31 = vld [vmem:[%s3805_s4 + $0x168] ss:$16 sps:$4 sm:$0xff]   ;;  %v3226_v33 = vld [vmem:[%s3805_s4 + $0x18c] ss:$16 sps:$4 sm:$0xff]  }
 0x211   : > { %v2848_v30 = vcombine.high %v1545_v28, %v1545_v28  ;;  %v3224_v32 = vld [vmem:[%s3805_s4 + $0x184] ss:$16 sps:$4 sm:$0xff]   ;;  %v3228_v34 = vld [vmem:[%s3805_s4 + $0x180] ss:$16 sps:$4 sm:$0xff]   ;;  %v3229_v35 = vld [vmem:[%s3805_s4 + $0x188] ss:$16 sps:$4 sm:$0xff]   ;;  %v2847_v50 = vcombine.low %v1545_v28, %v1545_v28 }
 0x212   : > { %2360 = vmatpush1.bf16.msra.mxu0 %v3180_v0  ;;  %2442 = vmatpush1.bf16.msra.mxu1 %v3181_v1  ;;  %v3230_v36 = vld [vmem:[%s3805_s4 + $0x1a4] ss:$16 sps:$4 sm:$0xff]   ;;  %v3232_v37 = vld [vmem:[%s3805_s4 + $0x1ac] ss:$16 sps:$4 sm:$0xff]   ;;  %v3234_v38 = vld [vmem:[%s3805_s4 + $0x1a0] ss:$16 sps:$4 sm:$0xff]  }
 0x213   : > { %2361 = vmatprep.subr.bf16.mxu0 %v3182_v2  ;;  %2443 = vmatprep.subr.bf16.mxu1 %v3184_v3  ;;  %v3235_v39 = vld [vmem:[%s3805_s4 + $0x1a8] ss:$16 sps:$4 sm:$0xff]   ;;  %v3236_v40 = vld [vmem:[%s3805_s4 + $0x1c4] ss:$16 sps:$4 sm:$0xff]   ;;  %v3238_v41 = vld [vmem:[%s3805_s4 + $0x1cc] ss:$16 sps:$4 sm:$0xff]  }
 0x214   : > { %2383 = vmatprep.mubr.bf16.mxu0 %v2848_v30  ;;  %2465 = vmatprep.mubr.bf16.mxu1 %v2848_v30  ;;  %v3240_v42 = vld [vmem:[%s3805_s4 + $0x1c0] ss:$16 sps:$4 sm:$0xff]   ;;  %v3241_v43 = vld [vmem:[%s3805_s4 + $0x1c8] ss:$16 sps:$4 sm:$0xff]   ;;  %v3242_v44 = vld [vmem:[%s3805_s4 + $0x1e4] ss:$16 sps:$4 sm:$0xff]  }
 0x215   : > { %v3244_v45 = vld [vmem:[%s3805_s4 + $0x1ec] ss:$16 sps:$4 sm:$0xff]   ;;  %v3246_v46 = vld [vmem:[%s3805_s4 + $0x1e0] ss:$16 sps:$4 sm:$0xff]   ;;  %v3247_v47 = vld [vmem:[%s3805_s4 + $0x1e8] ss:$16 sps:$4 sm:$0xff]  }
 0x216   : > { %2362 = vmatpush1.bf16.msra.mxu0 %v3186_v4  ;;  %2444 = vmatpush1.bf16.msra.mxu1 %v3187_v5  ;;  %v3252_v48 = vld [vmem:[%s3805_s4 + $0x204] ss:$16 sps:$4 sm:$0xff]   ;;  %v3255_v49 = vld [vmem:[%s3805_s4 + $0x20c] ss:$16 sps:$4 sm:$0xff]   ;;  %v3250_v51 = vld [vmem:[%s3805_s4 + $0x200] ss:$16 sps:$4 sm:$0xff]  }
 0x217   : > { %2363 = vmatprep.subr.bf16.mxu0 %v3188_v6  ;;  %2445 = vmatprep.subr.bf16.mxu1 %v3190_v7  ;;  %v3253_v52 = vld [vmem:[%s3805_s4 + $0x208] ss:$16 sps:$4 sm:$0xff]   ;;  %v3258_v53 = vld [vmem:[%s3805_s4 + $0x224] ss:$16 sps:$4 sm:$0xff]   ;;  %v3261_v54 = vld [vmem:[%s3805_s4 + $0x22c] ss:$16 sps:$4 sm:$0xff]  }
 0x218   : > { %v3256_v55 = vld [vmem:[%s3805_s4 + $0x220] ss:$16 sps:$4 sm:$0xff]   ;;  %v3259_v56 = vld [vmem:[%s3805_s4 + $0x228] ss:$16 sps:$4 sm:$0xff]   ;;  %v3264_v57 = vld [vmem:[%s3805_s4 + $0x244] ss:$16 sps:$4 sm:$0xff]  }
 0x219   : > { %v3267_v58 = vld [vmem:[%s3805_s4 + $0x24c] ss:$16 sps:$4 sm:$0xff]   ;;  %v3262_v59 = vld [vmem:[%s3805_s4 + $0x240] ss:$16 sps:$4 sm:$0xff]   ;;  %v3265_v60 = vld [vmem:[%s3805_s4 + $0x248] ss:$16 sps:$4 sm:$0xff]  }
 0x21a   : > { %2364 = vmatpush1.bf16.msra.mxu0 %v3192_v8  ;;  %2446 = vmatpush1.bf16.msra.mxu1 %v3193_v9  ;;  %v3270_v61 = vld [vmem:[%s3805_s4 + $0x264] ss:$16 sps:$4 sm:$0xff]   ;;  %v3273_v62 = vld [vmem:[%s3805_s4 + $0x26c] ss:$16 sps:$4 sm:$0xff]   ;;  %v3268_v63 = vld [vmem:[%s3805_s4 + $0x260] ss:$16 sps:$4 sm:$0xff]  }
 0x21b   : > { %2365 = vmatprep.subr.bf16.mxu0 %v3194_v10  ;;  %2447 = vmatprep.subr.bf16.mxu1 %v3196_v11  ;;  %v3271_v0 = vld [vmem:[%s3805_s4 + $0x268] ss:$16 sps:$4 sm:$0xff]   ;;  %v3276_v1 = vld [vmem:[%s3805_s4 + $0x284] ss:$16 sps:$4 sm:$0xff]   ;;  %v3279_v2 = vld [vmem:[%s3805_s4 + $0x28c] ss:$16 sps:$4 sm:$0xff]  }
 0x21c   : > { %v3274_v3 = vld [vmem:[%s3805_s4 + $0x280] ss:$16 sps:$4 sm:$0xff]   ;;  %v3277_v4 = vld [vmem:[%s3805_s4 + $0x288] ss:$16 sps:$4 sm:$0xff]   ;;  %v3282_v5 = vld [vmem:[%s3805_s4 + $0x2a4] ss:$16 sps:$4 sm:$0xff]  }
 0x21d   : > { %v3285_v6 = vld [vmem:[%s3805_s4 + $0x2ac] ss:$16 sps:$4 sm:$0xff]   ;;  %v3280_v7 = vld [vmem:[%s3805_s4 + $0x2a0] ss:$16 sps:$4 sm:$0xff]   ;;  %v3283_v8 = vld [vmem:[%s3805_s4 + $0x2a8] ss:$16 sps:$4 sm:$0xff]  }
 0x21e   : > { %2366 = vmatpush1.bf16.msra.mxu0 %v3198_v12  ;;  %2448 = vmatpush1.bf16.msra.mxu1 %v3199_v13  ;;  %v3288_v9 = vld [vmem:[%s3805_s4 + $0x2c4] ss:$16 sps:$4 sm:$0xff]   ;;  %v3291_v10 = vld [vmem:[%s3805_s4 + $0x2cc] ss:$16 sps:$4 sm:$0xff]   ;;  %v3310_v30 = vld [vmem:[%s3805_s4 + $0x340] ss:$16 sps:$4 sm:$0xff]  }
 0x21f   : > { %2367 = vmatprep.subr.bf16.mxu0 %v3200_v14  ;;  %2449 = vmatprep.subr.bf16.mxu1 %v3202_v15  ;;  %v4128_v11 = vld [vmem:[#allocation3 + $0x8] sm:$0xff]  ;;  %v2515_v13 = vld [vmem:[%s3797_s20] sm:$0xff] }
 0x220   : > { %v2850_v12 = vcombine.high %v4128_v11, %v4128_v11  ;;  %2518 = vperm.xlu0 %3151, %v2515_v13   ;;  %v3286_v14 = vld [vmem:[%s3805_s4 + $0x2c0] ss:$16 sps:$4 sm:$0xff]   ;;  %v3289_v15 = vld [vmem:[%s3805_s4 + $0x2c8] ss:$16 sps:$4 sm:$0xff]   ;;  %v3312_v28 = vld [vmem:[%s3805_s4 + $0x344] ss:$16 sps:$4 sm:$0xff]  }
 0x222   : > { %2368 = vmatpush1.bf16.msra.mxu0 %v3204_v16  ;;  %2450 = vmatpush1.bf16.msra.mxu1 %v3205_v17  ;;  %v3294_v16 = vld [vmem:[%s3805_s4 + $0x2e4] ss:$16 sps:$4 sm:$0xff]   ;;  %v3297_v17 = vld [vmem:[%s3805_s4 + $0x2ec] ss:$16 sps:$4 sm:$0xff]  }
 0x223   : > { %2369 = vmatprep.subr.bf16.mxu0 %v3206_v18  ;;  %2451 = vmatprep.subr.bf16.mxu1 %v3208_v19  ;;  %v3292_v18 = vld [vmem:[%s3805_s4 + $0x2e0] ss:$16 sps:$4 sm:$0xff]   ;;  %v3295_v19 = vld [vmem:[%s3805_s4 + $0x2e8] ss:$16 sps:$4 sm:$0xff]  }
 0x226   : > { %2370 = vmatpush1.bf16.msra.mxu0 %v3210_v20  ;;  %2452 = vmatpush1.bf16.msra.mxu1 %v3211_v21  ;;  %v3300_v20 = vld [vmem:[%s3805_s4 + $0x304] ss:$16 sps:$4 sm:$0xff]   ;;  %v3303_v21 = vld [vmem:[%s3805_s4 + $0x30c] ss:$16 sps:$4 sm:$0xff]  }
 0x227   : > { %2371 = vmatprep.subr.bf16.mxu0 %v3212_v22  ;;  %2453 = vmatprep.subr.bf16.mxu1 %v3214_v23  ;;  %v3298_v22 = vld [vmem:[%s3805_s4 + $0x300] ss:$16 sps:$4 sm:$0xff]   ;;  %v3301_v23 = vld [vmem:[%s3805_s4 + $0x308] ss:$16 sps:$4 sm:$0xff]  }
 0x22a   : > { %2372 = vmatpush1.bf16.msra.mxu0 %v3216_v24  ;;  %2454 = vmatpush1.bf16.msra.mxu1 %v3217_v25  ;;  %v3306_v24 = vld [vmem:[%s3805_s4 + $0x324] ss:$16 sps:$4 sm:$0xff]   ;;  %v3309_v25 = vld [vmem:[%s3805_s4 + $0x32c] ss:$16 sps:$4 sm:$0xff]  }
 0x22b   : > { %2373 = vmatprep.subr.bf16.mxu0 %v3218_v26  ;;  %2455 = vmatprep.subr.bf16.mxu1 %v3220_v27  ;;  %v3304_v26 = vld [vmem:[%s3805_s4 + $0x320] ss:$16 sps:$4 sm:$0xff]   ;;  %v3307_v27 = vld [vmem:[%s3805_s4 + $0x328] ss:$16 sps:$4 sm:$0xff]  }
 0x22e   : > { %2374 = vmatpush1.bf16.msra.mxu0 %v3222_v29  ;;  %2456 = vmatpush1.bf16.msra.mxu1 %v3223_v31  ;;  %v3315_v29 = vld [vmem:[%s3805_s4 + $0x34c] ss:$16 sps:$4 sm:$0xff]   ;;  %v3313_v31 = vld [vmem:[%s3805_s4 + $0x348] ss:$16 sps:$4 sm:$0xff]  }
 0x22f   : > { %2375 = vmatprep.subr.bf16.mxu0 %v3224_v32  ;;  %2457 = vmatprep.subr.bf16.mxu1 %v3226_v33  ;;  %v3318_v32 = vld [vmem:[%s3805_s4 + $0x364] ss:$16 sps:$4 sm:$0xff]   ;;  %v3321_v33 = vld [vmem:[%s3805_s4 + $0x36c] ss:$16 sps:$4 sm:$0xff]  }
 0x232   : > { %2376 = vmatpush1.bf16.msra.mxu0 %v3228_v34  ;;  %2458 = vmatpush1.bf16.msra.mxu1 %v3229_v35  ;;  %v3316_v34 = vld [vmem:[%s3805_s4 + $0x360] ss:$16 sps:$4 sm:$0xff]   ;;  %v3319_v35 = vld [vmem:[%s3805_s4 + $0x368] ss:$16 sps:$4 sm:$0xff]  }
 0x233   : > { %2377 = vmatprep.subr.bf16.mxu0 %v3230_v36  ;;  %2459 = vmatprep.subr.bf16.mxu1 %v3232_v37  ;;  %v3324_v36 = vld [vmem:[%s3805_s4 + $0x384] ss:$16 sps:$4 sm:$0xff]   ;;  %v3327_v37 = vld [vmem:[%s3805_s4 + $0x38c] ss:$16 sps:$4 sm:$0xff]  }
 0x236   : > { %2378 = vmatpush1.bf16.msra.mxu0 %v3234_v38  ;;  %2460 = vmatpush1.bf16.msra.mxu1 %v3235_v39  ;;  %v3322_v38 = vld [vmem:[%s3805_s4 + $0x380] ss:$16 sps:$4 sm:$0xff]   ;;  %v3325_v39 = vld [vmem:[%s3805_s4 + $0x388] ss:$16 sps:$4 sm:$0xff]  }
 0x237   : > { %2379 = vmatprep.subr.bf16.mxu0 %v3236_v40  ;;  %2461 = vmatprep.subr.bf16.mxu1 %v3238_v41  ;;  %v3330_v40 = vld [vmem:[%s3805_s4 + $0x3a4] ss:$16 sps:$4 sm:$0xff]   ;;  %v3333_v41 = vld [vmem:[%s3805_s4 + $0x3ac] ss:$16 sps:$4 sm:$0xff]  }
 0x23a   : > { %2380 = vmatpush1.bf16.msra.mxu0 %v3240_v42  ;;  %2462 = vmatpush1.bf16.msra.mxu1 %v3241_v43  ;;  %v3328_v42 = vld [vmem:[%s3805_s4 + $0x3a0] ss:$16 sps:$4 sm:$0xff]   ;;  %v3331_v43 = vld [vmem:[%s3805_s4 + $0x3a8] ss:$16 sps:$4 sm:$0xff]  }
 0x23b   : > { %2381 = vmatprep.subr.bf16.mxu0 %v3242_v44  ;;  %2463 = vmatprep.subr.bf16.mxu1 %v3244_v45  ;;  %v3336_v44 = vld [vmem:[%s3805_s4 + $0x3c4] ss:$16 sps:$4 sm:$0xff]   ;;  %v3339_v45 = vld [vmem:[%s3805_s4 + $0x3cc] ss:$16 sps:$4 sm:$0xff]  }
 0x23e   : > { %2382 = vmatpush1.bf16.msra.mxu0 %v3246_v46  ;;  %2464 = vmatpush1.bf16.msra.mxu1 %v3247_v47  ;;  %v3334_v46 = vld [vmem:[%s3805_s4 + $0x3c0] ss:$16 sps:$4 sm:$0xff]   ;;  %v3337_v47 = vld [vmem:[%s3805_s4 + $0x3c8] ss:$16 sps:$4 sm:$0xff]  }
 0x23f   : > { %2392 = vmatprep.subr.bf16.mxu0 %v3252_v48  ;;  %2474 = vmatprep.subr.bf16.mxu1 %v3255_v49  ;;  %v3342_v48 = vld [vmem:[%s3805_s4 + $0x3e4] ss:$16 sps:$4 sm:$0xff]   ;;  %v3345_v49 = vld [vmem:[%s3805_s4 + $0x3ec] ss:$16 sps:$4 sm:$0xff]  }
 0x241   : > { %2384 = vmatmul.mubr.bf16.vlgmr.msra.gmra.mrb[0].mxu0 %v2847_v50  ;;  %2466 = vmatmul.mubr.bf16.vlgmr.msra.gmra.mrb[0].mxu1 %v2847_v50  ;;  %v3340_v50 = vld [vmem:[%s3805_s4 + $0x3e0] ss:$16 sps:$4 sm:$0xff]  }
 0x242   : > { %2393 = vmatpush1.bf16.msra.mxu0 %v3250_v51  ;;  %2475 = vmatpush1.bf16.msra.mxu1 %v3253_v52  ;;  %v3343_v51 = vld [vmem:[%s3805_s4 + $0x3e8] ss:$16 sps:$4 sm:$0xff]   ;;  %v2849_v52 = vcombine.low %v4128_v11, %v4128_v11 }
 0x243   : > { %2394 = vmatprep.subr.bf16.mxu0 %v3258_v53  ;;  %2476 = vmatprep.subr.bf16.mxu1 %v3261_v54  ;;  %v1677_v53 = vlaneseq }
 0x244   : > { %2424 = vmatprep.mubr.bf16.mxu0 %v2850_v12  ;;  %2506 = vmatprep.mubr.bf16.mxu1 %v2850_v12 }
 0x245   : > { %v1678_v54 = vshrl.u32 %v1677_v53, 7 }
 0x246   : > { %2395 = vmatpush1.bf16.msra.mxu0 %v3256_v55  ;;  %2477 = vmatpush1.bf16.msra.mxu1 %v3259_v56 }
 0x247   : > { %2396 = vmatprep.subr.bf16.mxu0 %v3264_v57  ;;  %2478 = vmatprep.subr.bf16.mxu1 %v3267_v58  ;;  %v1679_v55 = vsub.s32 0, %v1678_v54  ;;  %v1687_v56 = vsub.s32 2, %v1678_v54  ;;  %v1675_v57 = vld [vmem:[%s4217_s21] sm:$0xf]  ;;  %v1683_v58 = vsub.s32 1, %v1678_v54 }
 0x24a   : > { %2397 = vmatpush1.bf16.msra.mxu0 %v3262_v59  ;;  %2479 = vmatpush1.bf16.msra.mxu1 %v3265_v60  ;;  %v1691_v59 = vsub.s32 3, %v1678_v54  ;;  %v1680_v60 = vrot.slane %v1675_v57, %v1679_v55 }
 0x24b   : > { %2398 = vmatprep.subr.bf16.mxu0 %v3270_v61  ;;  %2480 = vmatprep.subr.bf16.mxu1 %v3273_v62  ;;  %v1688_v61 = vrot.slane %v1675_v57, %v1687_v56  ;;  %v1684_v62 = vrot.slane %v1675_v57, %v1683_v58 }
 0x24e   : > { %2399 = vmatpush1.bf16.msra.mxu0 %v3268_v63  ;;  %2481 = vmatpush1.bf16.msra.mxu1 %v3271_v0  ;;  %v1692_v63 = vrot.slane %v1675_v57, %v1691_v59 }
 0x24f   : > { %2400 = vmatprep.subr.bf16.mxu0 %v3276_v1  ;;  %2482 = vmatprep.subr.bf16.mxu1 %v3279_v2 }
 0x252   : > { %2401 = vmatpush1.bf16.msra.mxu0 %v3274_v3  ;;  %2483 = vmatpush1.bf16.msra.mxu1 %v3277_v4 }
 0x253   : > { %2402 = vmatprep.subr.bf16.mxu0 %v3282_v5  ;;  %2484 = vmatprep.subr.bf16.mxu1 %v3285_v6 }
 0x256   : > { %2403 = vmatpush1.bf16.msra.mxu0 %v3280_v7  ;;  %2485 = vmatpush1.bf16.msra.mxu1 %v3283_v8 }
 0x257   : > { %2404 = vmatprep.subr.bf16.mxu0 %v3288_v9  ;;  %2486 = vmatprep.subr.bf16.mxu1 %v3291_v10 }
 0x25a   : > { %2405 = vmatpush1.bf16.msra.mxu0 %v3286_v14  ;;  %2487 = vmatpush1.bf16.msra.mxu1 %v3289_v15 }
 0x25b   : > { %2406 = vmatprep.subr.bf16.mxu0 %v3294_v16  ;;  %2488 = vmatprep.subr.bf16.mxu1 %v3297_v17 }
 0x25e   : > { %2407 = vmatpush1.bf16.msra.mxu0 %v3292_v18  ;;  %2489 = vmatpush1.bf16.msra.mxu1 %v3295_v19 }
 0x25f   : > { %2408 = vmatprep.subr.bf16.mxu0 %v3300_v20  ;;  %2490 = vmatprep.subr.bf16.mxu1 %v3303_v21 }
 0x262   : > { %2409 = vmatpush1.bf16.msra.mxu0 %v3298_v22  ;;  %2491 = vmatpush1.bf16.msra.mxu1 %v3301_v23 }
 0x263   : > { %2410 = vmatprep.subr.bf16.mxu0 %v3306_v24  ;;  %2492 = vmatprep.subr.bf16.mxu1 %v3309_v25 }
 0x266   : > { %2411 = vmatpush1.bf16.msra.mxu0 %v3304_v26  ;;  %2493 = vmatpush1.bf16.msra.mxu1 %v3307_v27 }
 0x267   : > { %2412 = vmatprep.subr.bf16.mxu0 %v3312_v28  ;;  %2494 = vmatprep.subr.bf16.mxu1 %v3315_v29 }
 0x26a   : > { %2413 = vmatpush1.bf16.msra.mxu0 %v3310_v30  ;;  %2495 = vmatpush1.bf16.msra.mxu1 %v3313_v31 }
 0x26b   : > { %2414 = vmatprep.subr.bf16.mxu0 %v3318_v32  ;;  %2496 = vmatprep.subr.bf16.mxu1 %v3321_v33 }
 0x26e   : > { %2415 = vmatpush1.bf16.msra.mxu0 %v3316_v34  ;;  %2497 = vmatpush1.bf16.msra.mxu1 %v3319_v35 }
 0x26f   : > { %2416 = vmatprep.subr.bf16.mxu0 %v3324_v36  ;;  %2498 = vmatprep.subr.bf16.mxu1 %v3327_v37 }
 0x272   : > { %2417 = vmatpush1.bf16.msra.mxu0 %v3322_v38  ;;  %2499 = vmatpush1.bf16.msra.mxu1 %v3325_v39 }
 0x273   : > { %2418 = vmatprep.subr.bf16.mxu0 %v3330_v40  ;;  %2500 = vmatprep.subr.bf16.mxu1 %v3333_v41 }
 0x276   : > { %2419 = vmatpush1.bf16.msra.mxu0 %v3328_v42  ;;  %2501 = vmatpush1.bf16.msra.mxu1 %v3331_v43 }
 0x277   : > { %2420 = vmatprep.subr.bf16.mxu0 %v3336_v44  ;;  %2502 = vmatprep.subr.bf16.mxu1 %v3339_v45 }
 0x27a   : > { %2421 = vmatpush1.bf16.msra.mxu0 %v3334_v46  ;;  %2503 = vmatpush1.bf16.msra.mxu1 %v3337_v47 }
 0x27b   : > { %2422 = vmatprep.subr.bf16.mxu0 %v3342_v48  ;;  %2504 = vmatprep.subr.bf16.mxu1 %v3345_v49 }
 0x27e   : > { %2423 = vmatpush1.bf16.msra.mxu0 %v3340_v50  ;;  %2505 = vmatpush1.bf16.msra.mxu1 %v3343_v51 }
 0x281   : > { %2425 = vmatmul.mubr.bf16.vlgmr.msra.gmra.mrb[0].mxu0 %v2849_v52  ;;  %2507 = vmatmul.mubr.bf16.vlgmr.msra.gmra.mrb[0].mxu1 %v2849_v52 }
 0x29f   : > { %v2519_v0 = vpop.permute.xlu0 %2518 }
 0x354   : > { %v2426_v1 = vpop.f32.mrb[0].mxu0  ;;  %v2508_v2 = vpop.f32.mrb[0].mxu1 }
 0x355   : > { %v2985_v3 = vadd.f32 %v2426_v1, %v1680_v60  ;;  %v2987_v4 = vadd.f32 %v2508_v2, %v1688_v61  ;;  %v2428_v5 = vpop.f32.mrb[1].mxu0  ;;  %v2510_v6 = vpop.f32.mrb[1].mxu1 }
 0x356   : > { %v2986_v7 = vadd.f32 %v2428_v5, %v1684_v62  ;;  %v2988_v8 = vadd.f32 %v2510_v6, %v1692_v63  ;;  %v2430_v9 = vpop.f32.mrb[2].mxu0  ;;  %v2512_v10 = vpop.f32.mrb[2].mxu1 }
 0x357   : > { %v2521_v11 = vmul.f32 %v2985_v3, %v2519_v0  ;;  %v2523_v12 = vmul.f32 %v2987_v4, %v2519_v0  ;;  %v2431_v13 = vpop.f32.mrb[3].mxu0  ;;  %v2513_v14 = vpop.f32.mrb[3].mxu1 }
 0x358   : > { %v2522_v15 = vmul.f32 %v2986_v7, %v2519_v0  ;;  %v2524_v16 = vmul.f32 %v2988_v8, %v2519_v0 }
 0x359   : > { %2525 = vst [vmem:[%s3803_s24] sm:$0xff] %v2521_v11  ;;  %2527 = vst [vmem:[%s3803_s24 + $0x10] sm:$0xff] %v2523_v12 }
 0x35a   : > { %2526 = vst [vmem:[%s3803_s24 + $0x8] sm:$0xff] %v2522_v15  ;;  %2528 = vst [vmem:[%s3803_s24 + $0x18] sm:$0xff] %v2524_v16 }
 0x35b PF: > { %s23_s11 = sadd.s32 1, %s3418_s11   ;;  %s4218_s29 = smov %s3398_s30 }
 0x35c   : > { %p20_p4 = scmp.ge.s32.totalorder %s23_s11, 6   ;;  %s4219_s30 = smov %s3514_s16 }
 0x35d   : > { %s4220_s8 = smov %s3410_s9  ;;  %s4221_s0 = smov %s3414_s10 }
 0x35e   : > { %s4222_s9 = smov %s4225_s12  ;;  %s4223_s10 = smov %s4229_s13 }
 0x35f   :  { %22 = sbr.rel (!%p20_p4) target bundleno = 20 (0x14), region = 443 }
 0x366   :  { %2559 = vsyncmov [#allocation4] }
 0x369   :  { %s2560_s4 = vpop.sfrf %2559 }
 0x36a   :  { %p2981_p5 = scmp.ne.s32.totalorder %s2560_s4, 0 }
 0x36c   :  { %2564 = shalt.err (%p2981_p5)  }

</bundles_post_ra>
